<compile_context>
chip_gen: v7x
topology: tpu7x:2x2x1
jax: 0.10.0
libtpu: 0.0.40
codegen_flags: <defaults>
</compile_context>

<pallas_src>
import functools

import jax
import jax.numpy as jnp
from jax.experimental import pallas as pl
from jax.experimental.pallas import tpu as pltpu

NUM_CLASSES = 2


# ------------------------------ tile helpers ------------------------------- #

def _row_tile(total, cap=16):
    """Row-tile (3rd-minor dim): any divisor of `total` up to `cap`."""
    if total <= cap:
        return total
    for t in range(cap, 0, -1):
        if total % t == 0:
            return t
    return total


def _m_tile(total, cap=256):
    """Sublane-dim tile: multiple of 8 dividing `total`, or the full extent."""
    if total <= cap:
        return total
    t = (cap // 8) * 8
    while t >= 8:
        if total % t == 0:
            return t
        t -= 8
    return total


def _lane_tile(total, cap=512):
    """Lane-dim tile: multiple of 128 dividing `total`, or the full extent."""
    if total <= cap:
        return total
    t = (cap // 128) * 128
    while t >= 128:
        if total % t == 0:
            return t
        t -= 128
    return total


# ----------------------------- Pallas kernels ------------------------------ #

def _conv3x3_s1_kernel(x_ref, w_ref, b_ref, o_ref, *, relu):
    # x_ref: (1, Hp, Wp, Cin) padded bf16 image for this batch element.
    # w_ref: (9, Cin, Cout) bf16.  b_ref: (1, Cout) f32.  o_ref: (1, th, Wo, Cout).
    _, th, wo, cout = o_ref.shape
    cin = x_ref.shape[-1]
    row0 = pl.program_id(1) * th
    # One dynamic-row load per grid step; the 9 tap windows are static slices
    # of the loaded slab (no HBM im2col, no per-tap DMA).
    slab = x_ref[0, pl.ds(row0, th + 2), :, :]            # (th+2, Wp, Cin)
    acc = jnp.zeros((th * wo, cout), jnp.float32)
    for t in range(9):
        i, j = t // 3, t % 3
        win = slab[i:i + th, j:j + wo, :]                 # (th, Wo, Cin)
        acc = acc + jnp.dot(win.reshape(th * wo, cin), w_ref[t],
                            preferred_element_type=jnp.float32)
    y = acc + b_ref[...]
    if relu:
        y = jnp.maximum(y, 0.0)
    o_ref[...] = y.reshape(1, th, wo, cout).astype(o_ref.dtype)


def conv3x3_s1_pallas(x, w, b, *, relu, out_dtype):
    """3x3, stride 1, padding 1 conv.  x: (N,H,W,Cin) NHWC; w: (3,3,Cin,Cout)."""
    n, h, wd, cin = x.shape
    kh, kw, _, cout = w.shape
    assert (kh, kw) == (3, 3)
    xp = jnp.pad(x.astype(jnp.bfloat16), ((0, 0), (1, 1), (1, 1), (0, 0)))
    wt = w.reshape(9, cin, cout).astype(jnp.bfloat16)
    bt = b.reshape(1, cout).astype(jnp.float32)
    th = _row_tile(h, cap=16)
    return pl.pallas_call(
        functools.partial(_conv3x3_s1_kernel, relu=relu),
        out_shape=jax.ShapeDtypeStruct((n, h, wd, cout), out_dtype),
        grid=(n, h // th),
        in_specs=[
            # TODO(synk): for large real-SSD feature maps, switch this full
            # padded-image block to a halo'd row-window BlockSpec (pl.Element
            # offsets) and add a Cout grid axis so blocks stay VMEM-sized.
            pl.BlockSpec((1, h + 2, wd + 2, cin), lambda ni, ri: (ni, 0, 0, 0)),
            pl.BlockSpec((9, cin, cout), lambda ni, ri: (0, 0, 0)),
            pl.BlockSpec((1, cout), lambda ni, ri: (0, 0)),
        ],
        out_specs=pl.BlockSpec((1, th, wd, cout), lambda ni, ri: (ni, ri, 0, 0)),
        compiler_params=pltpu.CompilerParams(
            dimension_semantics=("parallel", "parallel")),
    )(xp, wt, bt)


def _tap_matmul_kernel(x_ref, w_ref, b_ref, o_ref, *, relu, ntaps):
    # x_ref: (ntaps, tm, Cin) bf16; w_ref: (ntaps, Cin, tn) bf16; b_ref: (1, tn).
    acc = jnp.zeros(o_ref.shape, jnp.float32)
    for t in range(ntaps):
        acc = acc + jnp.dot(x_ref[t], w_ref[t],
                            preferred_element_type=jnp.float32)
    y = acc + b_ref[...]
    if relu:
        y = jnp.maximum(y, 0.0)
    o_ref[...] = y.astype(o_ref.dtype)


def conv_tapsum_pallas(x, w, b, *, stride, padding, relu, out_dtype):
    """General small conv (used only for the tiny 'extras': 1x1 and 3x3 s2).
    Per-tap shifted views are stacked in the wrapper and accumulated in-kernel
    with M/N tiling; the large stride-1 3x3 layers use conv3x3_s1_pallas."""
    n, h, wd, cin = x.shape
    kh, kw, _, cout = w.shape
    ho = (h + 2 * padding - kh) // stride + 1
    wo = (wd + 2 * padding - kw) // stride + 1
    xp = jnp.pad(x.astype(jnp.bfloat16),
                 ((0, 0), (padding, padding), (padding, padding), (0, 0)))
    taps = [xp[:, i:i + (ho - 1) * stride + 1:stride,
               j:j + (wo - 1) * stride + 1:stride, :]
            for i in range(kh) for j in range(kw)]
    ntaps = kh * kw
    m = n * ho * wo
    xt = jnp.stack(taps, axis=0).reshape(ntaps, m, cin)
    wt = w.reshape(ntaps, cin, cout).astype(jnp.bfloat16)
    bt = b.reshape(1, cout).astype(jnp.float32)
    tm = _m_tile(m, cap=256)
    tn = _lane_tile(cout, cap=512)
    out = pl.pallas_call(
        functools.partial(_tap_matmul_kernel, relu=relu, ntaps=ntaps),
        out_shape=jax.ShapeDtypeStruct((m, cout), out_dtype),
        grid=(m // tm, cout // tn),
        in_specs=[
            pl.BlockSpec((ntaps, tm, cin), lambda mi, ni: (0, mi, 0)),
            pl.BlockSpec((ntaps, cin, tn), lambda mi, ni: (0, 0, ni)),
            pl.BlockSpec((1, tn), lambda mi, ni: (0, ni)),
        ],
        out_specs=pl.BlockSpec((tm, tn), lambda mi, ni: (mi, ni)),
        compiler_params=pltpu.CompilerParams(
            dimension_semantics=("parallel", "parallel")),
    )(xt, wt, bt)
    return out.reshape(n, ho, wo, cout)


def _maxpool2x2_kernel(x_ref, o_ref):
    v = x_ref[...]                               # (tm, 2, W2, 2*C)
    m = jnp.maximum(v[:, 0], v[:, 1])            # vertical max  -> (tm, W2, 2*C)
    c = o_ref.shape[-1]
    o_ref[...] = jnp.maximum(m[:, :, :c], m[:, :, c:])   # horizontal max


def maxpool2x2_pallas(x):
    """2x2 max pool, stride 2 (floor), NHWC.  Single tiled pass over a pure
    reshape view — no materialized strided phase copies."""
    n, h, wd, c = x.shape
    h2, w2 = h // 2, wd // 2
    x = x[:, :h2 * 2, :w2 * 2, :]                # floor behavior of MaxPool2d(2,2)
    m2 = n * h2
    xr = x.reshape(m2, 2, w2, 2 * c)             # pure reshape of row-major NHWC
    tm = _m_tile(m2, cap=256)
    out = pl.pallas_call(
        _maxpool2x2_kernel,
        out_shape=jax.ShapeDtypeStruct((m2, w2, c), x.dtype),
        grid=(m2 // tm,),
        in_specs=[pl.BlockSpec((tm, 2, w2, 2 * c), lambda i: (i, 0, 0, 0))],
        out_specs=pl.BlockSpec((tm, w2, c), lambda i: (i, 0, 0)),
        compiler_params=pltpu.CompilerParams(dimension_semantics=("parallel",)),
    )(xr)
    return out.reshape(n, h2, w2, c)


# ------------------------------ parameters --------------------------------- #

def _conv_init(key, kh, kw, cin, cout):
    kw_, kb_ = jax.random.split(key)
    scale = 1.0 / jnp.sqrt(kh * kw * cin)
    w = jax.random.normal(kw_, (kh, kw, cin, cout), jnp.float32) * scale
    b = jax.random.normal(kb_, (cout,), jnp.float32) * 0.01
    return w, b


def init_params(key):
    keys = jax.random.split(key, 6)
    p = {}
    # base: Conv2d(3,64,3,p=1), ReLU, Conv2d(64,64,3,p=1), ReLU, MaxPool2d(2,2)
    p["base0"] = _conv_init(keys[0], 3, 3, 3, 64)
    p["base2"] = _conv_init(keys[1], 3, 3, 64, 64)
    # TODO(synk): original extras are Conv2d(1024,256,1)/Conv2d(256,512,3,s2,p1);
    # the base output has 64 channels so the PyTorch forward cannot run as
    # written — channel counts adapted (64->128->256) to keep the graph valid.
    p["ex0"] = _conv_init(keys[2], 1, 1, 64, 128)
    p["ex1"] = _conv_init(keys[3], 3, 3, 128, 256)
    # TODO(synk): original loc/conf convs expect 512 input channels; sources[0]
    # (base output) has 64 -> in_channels adapted to 64.
    p["loc0"] = _conv_init(keys[4], 3, 3, 64, 4 * 4)
    p["conf0"] = _conv_init(keys[5], 3, 3, 64, 4 * NUM_CLASSES)
    return p


# ------------------------------- forward ----------------------------------- #

def ssd300_forward(x_nchw, p):
    x = jnp.transpose(x_nchw, (0, 2, 3, 1))      # NCHW -> NHWC
    # TODO(synk): PyTorch forward loops `for k in range(23)` but base defines
    # only 5 layers; we apply the 5 defined base layers (conv/relu/conv/relu/pool).
    x = conv3x3_s1_pallas(x, *p["base0"], relu=True, out_dtype=jnp.bfloat16)
    x = conv3x3_s1_pallas(x, *p["base2"], relu=True, out_dtype=jnp.bfloat16)
    x = maxpool2x2_pallas(x)
    sources = [x]
    # extras: F.relu(conv(x)); append after odd index (k == 1)
    x = conv_tapsum_pallas(x, *p["ex0"], stride=1, padding=0, relu=True,
                           out_dtype=jnp.bfloat16)
    x = conv_tapsum_pallas(x, *p["ex1"], stride=2, padding=1, relu=True,
                           out_dtype=jnp.bfloat16)
    sources.append(x)

    # zip(sources, loc, conf): only one loc/conf head -> applied to sources[0].
    # Fuse loc+conf into a single conv with Cout padded to 128 lanes.
    s0 = sources[0]
    wl, bl = p["loc0"]
    wc, bc = p["conf0"]
    cl, cc = wl.shape[-1], wc.shape[-1]
    w_head = jnp.concatenate([wl, wc], axis=-1)
    b_head = jnp.concatenate([bl, bc], axis=-1)
    pad = (-(cl + cc)) % 128
    if pad:
        w_head = jnp.pad(w_head, ((0, 0), (0, 0), (0, 0), (0, pad)))
        b_head = jnp.pad(b_head, ((0, pad),))
    head = conv3x3_s1_pallas(s0, w_head, b_head, relu=False,
                             out_dtype=jnp.float32)
    loc = head[..., :cl]                         # already NHWC == permute(0,2,3,1)
    conf = head[..., cl:cl + cc]
    n = loc.shape[0]
    loc = loc.reshape(n, -1).reshape(n, -1, 4)
    conf = conf.reshape(n, -1).reshape(n, -1, NUM_CLASSES)
    return loc, conf


# ------------------------- pure-JAX reference check ------------------------ #

def _conv_ref(x, w, b, stride, padding, relu, out_dtype):
    y = jax.lax.conv_general_dilated(
        x.astype(jnp.bfloat16), w.astype(jnp.bfloat16),
        (stride, stride), ((padding, padding), (padding, padding)),
        dimension_numbers=("NHWC", "HWIO", "NHWC"),
        preferred_element_type=jnp.float32) + b
    if relu:
        y = jnp.maximum(y, 0.0)
    return y.astype(out_dtype)


def ssd300_forward_ref(x_nchw, p):
    x = jnp.transpose(x_nchw, (0, 2, 3, 1))
    x = _conv_ref(x, *p["base0"], 1, 1, True, jnp.bfloat16)
    x = _conv_ref(x, *p["base2"], 1, 1, True, jnp.bfloat16)
    n, h, w, c = x.shape
    x = x.reshape(n, h // 2, 2, w // 2, 2, c).max(axis=(2, 4))
    s0 = x
    x = _conv_ref(x, *p["ex0"], 1, 0, True, jnp.bfloat16)
    x = _conv_ref(x, *p["ex1"], 2, 1, True, jnp.bfloat16)
    loc = _conv_ref(s0, *p["loc0"], 1, 1, False, jnp.float32)
    conf = _conv_ref(s0, *p["conf0"], 1, 1, False, jnp.float32)
    nb = loc.shape[0]
    return loc.reshape(nb, -1, 4), conf.reshape(nb, -1, NUM_CLASSES)


if __name__ == "__main__":
    key = jax.random.PRNGKey(0)
    kx, kp = jax.random.split(key)
    x = jax.random.normal(kx, (2, 3, 16, 16), jnp.float32)  # NCHW like PyTorch
    params = init_params(kp)

    loc, conf = ssd300_forward(x, params)
    loc, conf = jax.block_until_ready((loc, conf))

    loc_r, conf_r = ssd300_forward_ref(x, params)
    assert loc.shape == (2, 256, 4), loc.shape
    assert conf.shape == (2, 256, NUM_CLASSES), conf.shape
    assert jnp.allclose(loc, loc_r, rtol=1e-2, atol=1e-2)
    assert jnp.allclose(conf, conf_r, rtol=1e-2, atol=1e-2)
    print("KERNEL_OK")
</pallas_src>

<mosaic_0001>
module attributes {stable_mosaic.version = 11 : i64} {
  func.func @_conv3x3_s1_kernel(%arg0: i32, %arg1: i32, %arg2: memref<1x18x18x3xbf16, #tpu.memory_space<vmem>>, %arg3: memref<9x3x64xbf16, #tpu.memory_space<vmem>>, %arg4: memref<1x64xf32, #tpu.memory_space<vmem>>, %arg5: memref<1x16x16x64xbf16, #tpu.memory_space<vmem>>) attributes {dimension_semantics = [#tpu.dimension_semantics<parallel>, #tpu.dimension_semantics<parallel>], iteration_bounds = array<i64: 2, 1>, scalar_prefetch = 0 : i64, scratch_operands = 0 : i64, tpu.core_type = #tpu.core_type<tc>, window_params = [{transform_indices = @transform_0, window_bounds = array<i64: 1, 18, 18, 3>}, {pipeline_mode = #tpu.pipeline_mode<synchronous>, transform_indices = @transform_1, window_bounds = array<i64: 9, 3, 64>}, {pipeline_mode = #tpu.pipeline_mode<synchronous>, transform_indices = @transform_2, window_bounds = array<i64: 1, 64>}, {transform_indices = @transform_3, window_bounds = array<i64: 1, 16, 16, 64>}]} {
    %c16_i32 = arith.constant 16 : i32
    %0 = arith.muli %arg1, %c16_i32 : i32
    %c0 = arith.constant 0 : index
    %1 = arith.index_cast %0 : i32 to index
    %c0_0 = arith.constant 0 : index
    %c0_1 = arith.constant 0 : index
    %2 = vector.load %arg2[%c0, %1, %c0_0, %c0_1] : memref<1x18x18x3xbf16, #tpu.memory_space<vmem>>, vector<1x18x18x3xbf16>
    %3 = vector.shape_cast %2 : vector<1x18x18x3xbf16> to vector<18x18x3xbf16>
    %cst = arith.constant 0.000000e+00 : f32
    %4 = vector.broadcast %cst : f32 to vector<256x64xf32>
    %5 = vector.extract_strided_slice %3 {offsets = [0, 0, 0], sizes = [16, 16, 3], strides = [1, 1, 1]} : vector<18x18x3xbf16> to vector<16x16x3xbf16>
    %6 = vector.shape_cast %5 : vector<16x16x3xbf16> to vector<256x3xbf16>
    %c0_2 = arith.constant 0 : index
    %c0_3 = arith.constant 0 : index
    %c0_4 = arith.constant 0 : index
    %7 = vector.load %arg3[%c0_2, %c0_3, %c0_4] : memref<9x3x64xbf16, #tpu.memory_space<vmem>>, vector<1x3x64xbf16>
    %8 = vector.shape_cast %7 : vector<1x3x64xbf16> to vector<3x64xbf16>
    %cst_5 = arith.constant dense<0.000000e+00> : vector<256x64xf32>
    %9 = tpu.matmul %6, %8, %cst_5 {dimension_numbers = #tpu.dot_dimension_numbers<[1], [0], [0], [1], [0, 0, 1, 1], [], []>} : vector<256x3xbf16>, vector<3x64xbf16>, vector<256x64xf32> -> vector<256x64xf32>
    %10 = arith.addf %4, %9 : vector<256x64xf32>
    %11 = vector.extract_strided_slice %3 {offsets = [0, 1, 0], sizes = [16, 16, 3], strides = [1, 1, 1]} : vector<18x18x3xbf16> to vector<16x16x3xbf16>
    %12 = vector.shape_cast %11 : vector<16x16x3xbf16> to vector<256x3xbf16>
    %c1 = arith.constant 1 : index
    %c0_6 = arith.constant 0 : index
    %c0_7 = arith.constant 0 : index
    %13 = vector.load %arg3[%c1, %c0_6, %c0_7] : memref<9x3x64xbf16, #tpu.memory_space<vmem>>, vector<1x3x64xbf16>
    %14 = vector.shape_cast %13 : vector<1x3x64xbf16> to vector<3x64xbf16>
    %cst_8 = arith.constant dense<0.000000e+00> : vector<256x64xf32>
    %15 = tpu.matmul %12, %14, %cst_8 {dimension_numbers = #tpu.dot_dimension_numbers<[1], [0], [0], [1], [0, 0, 1, 1], [], []>} : vector<256x3xbf16>, vector<3x64xbf16>, vector<256x64xf32> -> vector<256x64xf32>
    %16 = arith.addf %10, %15 : vector<256x64xf32>
    %17 = vector.extract_strided_slice %3 {offsets = [0, 2, 0], sizes = [16, 16, 3], strides = [1, 1, 1]} : vector<18x18x3xbf16> to vector<16x16x3xbf16>
    %18 = vector.shape_cast %17 : vector<16x16x3xbf16> to vector<256x3xbf16>
    %c2 = arith.constant 2 : index
    %c0_9 = arith.constant 0 : index
    %c0_10 = arith.constant 0 : index
    %19 = vector.load %arg3[%c2, %c0_9, %c0_10] : memref<9x3x64xbf16, #tpu.memory_space<vmem>>, vector<1x3x64xbf16>
    %20 = vector.shape_cast %19 : vector<1x3x64xbf16> to vector<3x64xbf16>
    %cst_11 = arith.constant dense<0.000000e+00> : vector<256x64xf32>
    %21 = tpu.matmul %18, %20, %cst_11 {dimension_numbers = #tpu.dot_dimension_numbers<[1], [0], [0], [1], [0, 0, 1, 1], [], []>} : vector<256x3xbf16>, vector<3x64xbf16>, vector<256x64xf32> -> vector<256x64xf32>
    %22 = arith.addf %16, %21 : vector<256x64xf32>
    %23 = vector.extract_strided_slice %3 {offsets = [1, 0, 0], sizes = [16, 16, 3], strides = [1, 1, 1]} : vector<18x18x3xbf16> to vector<16x16x3xbf16>
    %24 = vector.shape_cast %23 : vector<16x16x3xbf16> to vector<256x3xbf16>
    %c3 = arith.constant 3 : index
    %c0_12 = arith.constant 0 : index
    %c0_13 = arith.constant 0 : index
    %25 = vector.load %arg3[%c3, %c0_12, %c0_13] : memref<9x3x64xbf16, #tpu.memory_space<vmem>>, vector<1x3x64xbf16>
    %26 = vector.shape_cast %25 : vector<1x3x64xbf16> to vector<3x64xbf16>
    %cst_14 = arith.constant dense<0.000000e+00> : vector<256x64xf32>
    %27 = tpu.matmul %24, %26, %cst_14 {dimension_numbers = #tpu.dot_dimension_numbers<[1], [0], [0], [1], [0, 0, 1, 1], [], []>} : vector<256x3xbf16>, vector<3x64xbf16>, vector<256x64xf32> -> vector<256x64xf32>
    %28 = arith.addf %22, %27 : vector<256x64xf32>
    %29 = vector.extract_strided_slice %3 {offsets = [1, 1, 0], sizes = [16, 16, 3], strides = [1, 1, 1]} : vector<18x18x3xbf16> to vector<16x16x3xbf16>
    %30 = vector.shape_cast %29 : vector<16x16x3xbf16> to vector<256x3xbf16>
    %c4 = arith.constant 4 : index
    %c0_15 = arith.constant 0 : index
    %c0_16 = arith.constant 0 : index
    %31 = vector.load %arg3[%c4, %c0_15, %c0_16] : memref<9x3x64xbf16, #tpu.memory_space<vmem>>, vector<1x3x64xbf16>
    %32 = vector.shape_cast %31 : vector<1x3x64xbf16> to vector<3x64xbf16>
    %cst_17 = arith.constant dense<0.000000e+00> : vector<256x64xf32>
    %33 = tpu.matmul %30, %32, %cst_17 {dimension_numbers = #tpu.dot_dimension_numbers<[1], [0], [0], [1], [0, 0, 1, 1], [], []>} : vector<256x3xbf16>, vector<3x64xbf16>, vector<256x64xf32> -> vector<256x64xf32>
    %34 = arith.addf %28, %33 : vector<256x64xf32>
    %35 = vector.extract_strided_slice %3 {offsets = [1, 2, 0], sizes = [16, 16, 3], strides = [1, 1, 1]} : vector<18x18x3xbf16> to vector<16x16x3xbf16>
    %36 = vector.shape_cast %35 : vector<16x16x3xbf16> to vector<256x3xbf16>
    %c5 = arith.constant 5 : index
    %c0_18 = arith.constant 0 : index
    %c0_19 = arith.constant 0 : index
    %37 = vector.load %arg3[%c5, %c0_18, %c0_19] : memref<9x3x64xbf16, #tpu.memory_space<vmem>>, vector<1x3x64xbf16>
    %38 = vector.shape_cast %37 : vector<1x3x64xbf16> to vector<3x64xbf16>
    %cst_20 = arith.constant dense<0.000000e+00> : vector<256x64xf32>
    %39 = tpu.matmul %36, %38, %cst_20 {dimension_numbers = #tpu.dot_dimension_numbers<[1], [0], [0], [1], [0, 0, 1, 1], [], []>} : vector<256x3xbf16>, vector<3x64xbf16>, vector<256x64xf32> -> vector<256x64xf32>
    %40 = arith.addf %34, %39 : vector<256x64xf32>
    %41 = vector.extract_strided_slice %3 {offsets = [2, 0, 0], sizes = [16, 16, 3], strides = [1, 1, 1]} : vector<18x18x3xbf16> to vector<16x16x3xbf16>
    %42 = vector.shape_cast %41 : vector<16x16x3xbf16> to vector<256x3xbf16>
    %c6 = arith.constant 6 : index
    %c0_21 = arith.constant 0 : index
    %c0_22 = arith.constant 0 : index
    %43 = vector.load %arg3[%c6, %c0_21, %c0_22] : memref<9x3x64xbf16, #tpu.memory_space<vmem>>, vector<1x3x64xbf16>
    %44 = vector.shape_cast %43 : vector<1x3x64xbf16> to vector<3x64xbf16>
    %cst_23 = arith.constant dense<0.000000e+00> : vector<256x64xf32>
    %45 = tpu.matmul %42, %44, %cst_23 {dimension_numbers = #tpu.dot_dimension_numbers<[1], [0], [0], [1], [0, 0, 1, 1], [], []>} : vector<256x3xbf16>, vector<3x64xbf16>, vector<256x64xf32> -> vector<256x64xf32>
    %46 = arith.addf %40, %45 : vector<256x64xf32>
    %47 = vector.extract_strided_slice %3 {offsets = [2, 1, 0], sizes = [16, 16, 3], strides = [1, 1, 1]} : vector<18x18x3xbf16> to vector<16x16x3xbf16>
    %48 = vector.shape_cast %47 : vector<16x16x3xbf16> to vector<256x3xbf16>
    %c7 = arith.constant 7 : index
    %c0_24 = arith.constant 0 : index
    %c0_25 = arith.constant 0 : index
    %49 = vector.load %arg3[%c7, %c0_24, %c0_25] : memref<9x3x64xbf16, #tpu.memory_space<vmem>>, vector<1x3x64xbf16>
    %50 = vector.shape_cast %49 : vector<1x3x64xbf16> to vector<3x64xbf16>
    %cst_26 = arith.constant dense<0.000000e+00> : vector<256x64xf32>
    %51 = tpu.matmul %48, %50, %cst_26 {dimension_numbers = #tpu.dot_dimension_numbers<[1], [0], [0], [1], [0, 0, 1, 1], [], []>} : vector<256x3xbf16>, vector<3x64xbf16>, vector<256x64xf32> -> vector<256x64xf32>
    %52 = arith.addf %46, %51 : vector<256x64xf32>
    %53 = vector.extract_strided_slice %3 {offsets = [2, 2, 0], sizes = [16, 16, 3], strides = [1, 1, 1]} : vector<18x18x3xbf16> to vector<16x16x3xbf16>
    %54 = vector.shape_cast %53 : vector<16x16x3xbf16> to vector<256x3xbf16>
    %c8 = arith.constant 8 : index
    %c0_27 = arith.constant 0 : index
    %c0_28 = arith.constant 0 : index
    %55 = vector.load %arg3[%c8, %c0_27, %c0_28] : memref<9x3x64xbf16, #tpu.memory_space<vmem>>, vector<1x3x64xbf16>
    %56 = vector.shape_cast %55 : vector<1x3x64xbf16> to vector<3x64xbf16>
    %cst_29 = arith.constant dense<0.000000e+00> : vector<256x64xf32>
    %57 = tpu.matmul %54, %56, %cst_29 {dimension_numbers = #tpu.dot_dimension_numbers<[1], [0], [0], [1], [0, 0, 1, 1], [], []>} : vector<256x3xbf16>, vector<3x64xbf16>, vector<256x64xf32> -> vector<256x64xf32>
    %58 = arith.addf %52, %57 : vector<256x64xf32>
    %c0_30 = arith.constant 0 : index
    %c0_31 = arith.constant 0 : index
    %59 = vector.load %arg4[%c0_30, %c0_31] : memref<1x64xf32, #tpu.memory_space<vmem>>, vector<1x64xf32>
    %60 = vector.broadcast %59 : vector<1x64xf32> to vector<256x64xf32>
    %61 = arith.addf %58, %60 : vector<256x64xf32>
    %cst_32 = arith.constant 0.000000e+00 : f32
    %62 = vector.broadcast %cst_32 : f32 to vector<256x64xf32>
    %63 = arith.maximumf %61, %62 : vector<256x64xf32>
    %64 = vector.shape_cast %63 : vector<256x64xf32> to vector<1x16x16x64xf32>
    %65 = arith.truncf %64 : vector<1x16x16x64xf32> to vector<1x16x16x64xbf16>
    %c0_33 = arith.constant 0 : index
    %c0_34 = arith.constant 0 : index
    %c0_35 = arith.constant 0 : index
    %c0_36 = arith.constant 0 : index
    %66 = vector.load %arg5[%c0_33, %c0_34, %c0_35, %c0_36] : memref<1x16x16x64xbf16, #tpu.memory_space<vmem>>, vector<1x16x16x64xbf16>
    tpu.vector_store %arg5[%c0_33, %c0_34, %c0_35, %c0_36], %65 {strides = array<i32>} : memref<1x16x16x64xbf16, #tpu.memory_space<vmem>>, vector<1x16x16x64xbf16>,
    return
  }
  func.func @transform_0(%arg0: i32, %arg1: i32) -> (i32, i32, i32, i32) {
    %c0_i32 = arith.constant 0 : i32
    %c0_i32_0 = arith.constant 0 : i32
    %c0_i32_1 = arith.constant 0 : i32
    %c0_i32_2 = arith.constant 0 : i32
    return %arg0, %c0_i32, %c0_i32_0, %c0_i32_1 : i32, i32, i32, i32
  }
  func.func @transform_1(%arg0: i32, %arg1: i32) -> (i32, i32, i32) {
    %c0_i32 = arith.constant 0 : i32
    %c0_i32_0 = arith.constant 0 : i32
    %c0_i32_1 = arith.constant 0 : i32
    %c0_i32_2 = arith.constant 0 : i32
    return %c0_i32, %c0_i32_0, %c0_i32_1 : i32, i32, i32
  }
  func.func @transform_2(%arg0: i32, %arg1: i32) -> (i32, i32) {
    %c0_i32 = arith.constant 0 : i32
    %c0_i32_0 = arith.constant 0 : i32
    %c0_i32_1 = arith.constant 0 : i32
    return %c0_i32, %c0_i32_0 : i32, i32
  }
  func.func @transform_3(%arg0: i32, %arg1: i32) -> (i32, i32, i32, i32) {
    %c0_i32 = arith.constant 0 : i32
    %c0_i32_0 = arith.constant 0 : i32
    %c0_i32_1 = arith.constant 0 : i32
    return %arg0, %arg1, %c0_i32, %c0_i32_0 : i32, i32, i32, i32
  }
}

</mosaic_0001>

<bundles_post_ra>
// kernel: tpu_custom_call.1
= control target key start
LH: loop header
LB: loop body
LE: loop exit
PB: predicated region body
PF: predicated region fallthrough
CT: control target
= control target key end

     0   :  { %8 = vsyncpa [#allocation3], 0  ;;  %s5614_s0 = inlined_call_operand.vmem [shape: bf16[2,18,18,3], index: 0, kind: input, shape index: {}]   ;;  %s5615_s1 = inlined_call_operand.vmem [shape: bf16[9,3,64], index: 1, kind: input, shape index: {}]   ;;  %s5616_s2 = inlined_call_operand.vmem [shape: f32[1,64], index: 2, kind: input, shape index: {}]   ;;  %s5617_s3 = inlined_call_operand.hbm [shape: bf16[2,16,16,64], index: 3, kind: output, shape index: {}]  }
   0x1   :  { %10 = vsyncpa [#allocation3 + $0x1], 0  ;;  %s4434_s12 = smov 0   ;;  %s4436_s13 = smov 0  }
   0x2   :  { %s4438_s14 = smov 0   ;;  %s4440_s15 = smov 0  }
   0x3   :  { %s4442_s16 = smov 0   ;;  %s4444_s17 = smov 0  }
   0x4 LB: > { %s3231_s18 = sadd.s32 4294967295, %s4408_s17   ;;  %s3232_s19 = sadd.s32 4294967294, %s4408_s17   ;;  %s4408_s17 = sphi %s4444_s17, %s16_s17   ;;  %s4404_s16 = sphi %s4442_s16, %s5705_s16   ;;  %s4400_s15 = sphi %s4440_s15, %s5704_s15   ;;  %s4396_s14 = sphi %s4438_s14, %s5703_s14   ;;  %s4392_s13 = sphi %s4436_s13, %s5702_s13   ;;  %s4388_s12 = sphi %s4434_s12, %s5701_s12  }
   0x5   : > { %s28_s20 = sadd.s32 1, %s4404_s16  ;;  %s105_s21 = sadd.s32 1, %s4396_s14 }
   0x6   : > { %p30_p0 = scmp.ge.s32.totalorder %s28_s20, 2  ;;  %p115_p1 = scmp.ne.s32.totalorder %s4396_s14, %s4392_s13 }
   0x7   : > { %p116_p2 = scmp.eq.s32.totalorder %s3231_s18, 1  ;;  %p121_p3 = scmp.ne.s32.totalorder %s4392_s13, %s4388_s12 }
   0x8   : > { %s5707_s20 = smov (%p30_p0, %s28_s20), 0  ;;  %p122_p5 = scmp.eq.s32.totalorder %s3232_s19, 1 }
   0x9   : > { %p4474_p4 = por %p116_p2, %p115_p1  ;;  %s100_s23 = ssub.s32 %s4404_s16, %s5707_s20 }
   0xa   : > { %p3235_p6 = scmp.ge.s32.totalorder %s4408_s17, 1  ;;  %p103_p7 = scmp.eq.s32.totalorder %s100_s23, 0 }
   0xb   : > { %p4481_p8 = por %p122_p5, %p121_p3  ;;  %p154_p9 = scmp.lt.s32.totalorder %s4408_s17, 3 }
   0xc   : > { %s4487_s25 = scalar_select %p103_p7, %s4396_s14, %s105_s21  }
   0xd   : > { %p155_p10 = pnand %p3235_p6, %p154_p9 }
   0xf   : > { %158 = sbr.rel (%p155_p10) target bundleno = 579 (0x243), region = 32 }
  0x16   : > { %v3238_v0 = vld [vmem:[%s5615_s1 + $0x2] sm:$0x3]  ;;  %vm730_vm0 = vcmask 1040384   ;;  %vm731_vm1 = vcmask 1041408   ;;  %p178_p11 = scmp.lt.s32.totalorder %s4400_s15, 1  ;;  %v4410_v1 = vmov 65535  }
  0x17   : > { %v732_v2 = vsel %vm730_vm0, 4294967295, %v4410_v1  ;;  %v3370_v3 = vld [vmem:[%s5615_s1 + $0x8] sm:$0x3]  ;;  %v243_v5 = vld [vmem:[%s5615_s1] sm:$0x3]  ;;  %vm681_vm4 = vcmask 23552  }
  0x18   : > { %v4496_v4 = vsel %vm731_vm1, %v732_v2, 0  ;;  %s179_s30 = scalar_select %p178_p11, %s4400_s15, 1  ;;  %v3389_v9 = vld [vmem:[%s5615_s1 + $0xa] sm:$0x3]  ;;  %vm244_vm2 = vsmask.f32 3328 }
  0x19   : > { %v735_v6 = vand.u32 %v3238_v0, %v4496_v4  ;;  %v4504_v7 = vand.u32 %v3370_v3, %v4496_v4  ;;  %v4507_v8 = vand.u32 %v4496_v4, %v243_v5  ;;  %v4513_v10 = vand.u32 %v3389_v9, %v4496_v4  ;;  %v3407_v11 = vld [vmem:[%s5615_s1 + $0xc] sm:$0x3]  ;;  %v3319_v12 = vld [vmem:[%s5615_s1 + $0x4] sm:$0x3]  ;;  %v3425_v13 = vld [vmem:[%s5615_s1 + $0xe] sm:$0x3] }
  0x1a   : > { %s4250_s8 = smul.u32 216, %s179_s30  ;;  %vm245_vm3 = vsmask.f32 7440  ;;  %v4554_v25 = vand.u32 %v3407_v11, %v4496_v4  ;;  %v4557_v26 = vand.u32 %v3319_v12, %v4496_v4  ;;  %v4560_v27 = vand.u32 %v3425_v13, %v4496_v4  ;;  %s175_s5 = sand.u32 1, %s4392_s13  }
  0x1b   : > { %5653 = vst [vmem:[#allocation5_spill] sm:$0xff] %v4504_v7  ;;  %3686 = vmatprep.subr.bf16.mxu1 %v735_v6  ;;  %3822 = vmatprep.subr.bf16.mxu0 %v4504_v7  ;;  %vm4572_vm5 = vmor %vm244_vm2, %vm245_vm3  ;;  %vm1206_vm6 = vcmask 1042432   ;;  %vm1207_vm7 = vcmask 1046532   ;;  %vm3106_vm9 = vcmask 519168   ;;  %s3532_s10 = sshll.u32 %s4400_s15, 11  ;;  %s5568_s15 = scalar_lea.sflag [#allocation3], %s175_s5 }
  0x1c   : > { %3687 = vmatpush3.bf16.msra.mxu1 %v735_v6  ;;  %3823 = vmatpush3.bf16.msra.mxu0 %v4504_v7  ;;  %s4520_s11 = scalar_lea.vmem %s5614_s0, %s4250_s8  ;;  %5654 = vst [vmem:[#allocation6_spill] sm:$0xff] %v4560_v27  ;;  %vm4746_vm8 = vmor %vm1206_vm6, %vm1207_vm7  ;;  %s3236_s8 = sshll.u32 %s175_s5, 7 }
  0x1d   : > { %v4532_v14 = vld [vmem:[%s4520_s11] sm:$0xf]  ;;  %v4535_v15 = vld [vmem:[%s4520_s11 + $0x4] sm:$0xf]  ;;  %v191_v16 = vld [vmem:[%s4520_s11 + $0x8] sm:$0x1]  ;;  %3720 = vmatprep.subr.bf16.mxu1 %v4507_v8  ;;  %3856 = vmatprep.subr.bf16.mxu0 %v4513_v10  ;;  %s5556_s21 = scalar_lea.hbm %s5617_s3, %s3532_s10 }
  0x1e   : > { %v248_v17 = vshrl.u32 %v4532_v14, 16  ;;  %v251_v18 = vshll.u32 %v4532_v14, 16  ;;  %v257_v19 = vshll.u32 %v4535_v15, 16  ;;  %v261_v20 = vshrl.u32 %v4535_v15, 16  ;;  %v4545_v21 = vld [vmem:[%s4520_s11 + $0xc] sm:$0xf] }
  0x1f   : > { %v267_v22 = vshll.u32 %v191_v16, 16  ;;  %v4548_v23 = vld [vmem:[%s4520_s11 + $0x10] sm:$0xf]  ;;  %v4551_v24 = vld [vmem:[%s4520_s11 + $0x14] sm:$0x1]  ;;  %v272_v33 = vshrl.u32 %v4545_v21, 16 }
  0x20   : > { %v250_v28 = vrot.slane %v248_v17, 4  ;;  %v253_v29 = vrot.slane %v251_v18, 5  ;;  %v259_v30 = vrot.slane %v257_v19, 5  ;;  %v263_v31 = vrot.slane %v261_v20, 4  ;;  %v4568_v40 = vld [vmem:[%s4520_s11 + $0x18] sm:$0xf] }
  0x21   : > { %v269_v32 = vrot.slane %v267_v22, 5  ;;  %v275_v34 = vshll.u32 %v4545_v21, 16  ;;  %v281_v35 = vshll.u32 %v4548_v23, 16  ;;  %v285_v38 = vshrl.u32 %v4548_v23, 16  ;;  %v4581_v46 = vld [vmem:[%s4520_s11 + $0x1c] sm:$0xf] }
  0x22   : > { %v254_v36 = vor.u32 %v253_v29, %v250_v28  ;;  %v264_v37 = vor.u32 %v263_v31, %v259_v30  ;;  %v291_v39 = vshll.u32 %v4551_v24, 16  ;;  %v274_v42 = vrot.slane %v272_v33, 4  ;;  %v4585_v53 = vld [vmem:[%s4520_s11 + $0x20] sm:$0x1]  ;;  %v4595_v0 = vld [vmem:[%s4520_s11 + $0x24] sm:$0xf] }
  0x23   : > { %v277_v43 = vrot.slane %v275_v34, 5  ;;  %v283_v44 = vrot.slane %v281_v35, 5  ;;  %v4578_v45 = vcombine.low %v4545_v21, %v4548_v23  ;;  %v287_v49 = vrot.slane %v285_v38, 4  ;;  %v4600_v6 = vld [vmem:[%s4520_s11 + $0x28] sm:$0xf]  ;;  %s5457_s9 = scalar_lea.vmem [#allocation2], %s3236_s8 }
  0x24   : > { %v255_v47 = vrot.slane %v254_v36, 4  ;;  %v265_v48 = vrot.slane %v264_v37, 4  ;;  %v293_v50 = vrot.slane %v291_v39, 5  ;;  %v1221_v52 = vrot.slane %v4551_v24, 5  ;;  %v4608_v16 = vld [vmem:[%s4520_s11 + $0x2c] sm:$0x1] }
  0x25   : > { %v278_v51 = vor.u32 %v277_v43, %v274_v42  ;;  %v296_v54 = vshrl.u32 %v4568_v40, 16  ;;  %v299_v55 = vshll.u32 %v4568_v40, 16  ;;  %v288_v58 = vor.u32 %v287_v49, %v283_v44  ;;  %v4614_v22 = vld [vmem:[%s4520_s11 + $0x30] sm:$0xf]  ;;  %v4621_v36 = vld [vmem:[%s4520_s11 + $0x34] sm:$0xf] }
  0x26   : > { %v260_v56 = vsel %vm4572_vm5, %v255_v47, %v259_v30  ;;  %v270_v57 = vsel %vm4572_vm5, %v265_v48, %v269_v32  ;;  %v305_v59 = vshll.u32 %v4581_v46, 16  ;;  %v309_v3 = vshrl.u32 %v4581_v46, 16  ;;  %v4628_v42 = vld [vmem:[%s4520_s11 + $0x38] sm:$0x1]  ;;  %s4411_s26 = smov [#allocation2]  }
  0x27   : > { %v3239_v60 = vcombine.low %v260_v56, %v270_v57  ;;  %v279_v61 = vrot.slane %v278_v51, 4  ;;  %v298_v62 = vrot.slane %v296_v54, 4  ;;  %v301_v63 = vrot.slane %v299_v55, 5  ;;  %v4636_v56 = vld [vmem:[%s4520_s11 + $0x3c] sm:$0xf]  ;;  %s4334_s27 = sshll.u32 %s4411_s26, 4  ;;  %s4335_s27 = int_to_ptr.vmem [resolvable:$false] %s4334_s27 }
  0x28   : > { %v289_v1 = vrot.slane %v288_v58, 4  ;;  %v307_v2 = vrot.slane %v305_v59, 5  ;;  %v315_v5 = vshll.u32 %v4585_v53, 16  ;;  %v1225_v12 = vrot.slane %v4581_v46, 5  ;;  %s4336_s28 = scalar_lea.vmem %s4335_s27, 4096 }
  0x29   : > { %3688 = vmatprep.mubr.msk.bf16.mxu1 %vm681_vm4, %v3239_v60  ;;  %v284_v9 = vsel %vm4572_vm5, %v279_v61, %v283_v44  ;;  %v302_v11 = vor.u32 %v301_v63, %v298_v62  ;;  %v1228_v13 = vrot.slane %v4585_v53, 5  ;;  %v311_v18 = vrot.slane %v309_v3, 4  ;;  %v4643_v60 = vld [vmem:[%s4520_s11 + $0x40] sm:$0xf] }
  0x2a   : > { %v294_v17 = vsel %vm4572_vm5, %v289_v1, %v293_v50  ;;  %v317_v19 = vrot.slane %v315_v5, 5  ;;  %v320_v20 = vshrl.u32 %v4595_v0, 16  ;;  %v323_v30 = vshll.u32 %v4595_v0, 16 }
  0x2b   : > { %v3240_v28 = vcombine.low %v284_v9, %v294_v17  ;;  %v303_v29 = vrot.slane %v302_v11, 4  ;;  %v329_v31 = vshll.u32 %v4600_v6, 16  ;;  %v312_v32 = vor.u32 %v311_v18, %v307_v2  ;;  %v4655_v18 = vld [vmem:[%s4520_s11 + $0x44] sm:$0x1] }
  0x2c   : > { %v322_v33 = vrot.slane %v320_v20, 4  ;;  %v333_v34 = vshrl.u32 %v4600_v6, 16  ;;  %v339_v35 = vshll.u32 %v4608_v16, 16  ;;  %v325_v38 = vrot.slane %v323_v30, 5 }
  0x2d   : > { %3824 = vmatprep.mubr.msk.bf16.mxu0 %vm681_vm4, %v3240_v28  ;;  %3689 = vmatmul.mubr.msk.bf16.vlgmr.msra.gmra.mrb[0].mxu1 %vm681_vm4, %v3240_v28  ;;  %v308_v37 = vsel %vm4572_vm5, %v303_v29, %v307_v2  ;;  %v331_v39 = vrot.slane %v329_v31, 5  ;;  %v344_v43 = vshrl.u32 %v4614_v22, 16  ;;  %v313_v44 = vrot.slane %v312_v32, 4  ;;  %v4660_v28 = vld [vmem:[%s4520_s11 + $0x48] sm:$0xf] }
  0x2e   : > { %3721 = vmatpush3.bf16.msra.mxu1 %v4507_v8  ;;  %v335_v47 = vrot.slane %v333_v34, 4  ;;  %v341_v48 = vrot.slane %v339_v35, 5  ;;  %v347_v49 = vshll.u32 %v4614_v22, 16  ;;  %v326_v50 = vor.u32 %v325_v38, %v322_v33  ;;  %v4667_v33 = vld [vmem:[%s4520_s11 + $0x4c] sm:$0xf] }
  0x2f   : > { %v346_v51 = vrot.slane %v344_v43, 4  ;;  %v353_v54 = vshll.u32 %v4621_v36, 16  ;;  %v357_v55 = vshrl.u32 %v4621_v36, 16  ;;  %3754 = vmatprep.subr.bf16.mxu1 %v4557_v26  ;;  %v318_v57 = vsel %vm4572_vm5, %v313_v44, %v317_v19 }
  0x30   : > { %v336_v58 = vor.u32 %v335_v47, %v331_v39  ;;  %v349_v8 = vrot.slane %v347_v49, 5  ;;  %v363_v59 = vshll.u32 %v4628_v42, 16  ;;  %v4645_v61 = vcombine.low %v308_v37, %v318_v57  ;;  %v4683_v49 = vld [vmem:[%s4520_s11 + $0x50] sm:$0x1] }
  0x31   : > { %v327_v62 = vrot.slane %v326_v50, 4  ;;  %v355_v63 = vrot.slane %v353_v54, 5  ;;  %v359_v1 = vrot.slane %v357_v55, 4  ;;  %v368_v9 = vshrl.u32 %v4636_v56, 16  ;;  %v4688_v54 = vld [vmem:[%s4520_s11 + $0x54] sm:$0xf] }
  0x32   : > { %5657 = vst [vmem:[#allocation7_spill] sm:$0xff] %v4645_v61  ;;  %v337_v2 = vrot.slane %v336_v58, 4  ;;  %v350_v3 = vor.u32 %v349_v8, %v346_v51  ;;  %v365_v5 = vrot.slane %v363_v59, 5  ;;  %3825 = vmatmul.mubr.msk.bf16.vlgmr.msra.gmra.mrb[0].mxu0 %vm681_vm4, %v4645_v61  ;;  %3692 = vmatprep.mubr.msk.bf16.mxu1 %vm681_vm4, %v4645_v61  ;;  %v371_v19 = vshll.u32 %v4636_v56, 16  ;;  %5659 = vst [vmem:[#allocation9_spill] sm:$0xff] %v4688_v54 }
  0x33   : > { %v332_v11 = vsel %vm4572_vm5, %v327_v62, %v331_v39  ;;  %v360_v17 = vor.u32 %v359_v1, %v355_v63  ;;  %v377_v20 = vshll.u32 %v4643_v60, 16  ;;  %3857 = vmatpush3.bf16.msra.mxu0 %v4513_v10  ;;  %v370_v31 = vrot.slane %v368_v9, 4  ;;  %v4693_v59 = vld [vmem:[%s4520_s11 + $0x58] sm:$0xf] }
  0x34   : > { %v342_v29 = vsel %vm4572_vm5, %v337_v2, %v341_v48  ;;  %v351_v30 = vrot.slane %v350_v3, 4  ;;  %v381_v32 = vshrl.u32 %v4643_v60, 16  ;;  %v373_v37 = vrot.slane %v371_v19, 5  ;;  %3890 = vmatprep.subr.bf16.mxu0 %v4554_v25  ;;  %5661 = vst [vmem:[#allocation11_spill] sm:$0xff] %v4693_v59 }
  0x35   : > { %v4669_v34 = vcombine.low %v332_v11, %v342_v29  ;;  %v361_v35 = vrot.slane %v360_v17, 4  ;;  %v379_v38 = vrot.slane %v377_v20, 5  ;;  %v387_v43 = vshll.u32 %v4655_v18, 16  ;;  %v4706_v29 = vld [vmem:[%s4520_s11 + $0x5c] sm:$0x1] }
  0x36   : > { %v356_v10 = vsel %vm4572_vm5, %v351_v30, %v355_v63  ;;  %v383_v39 = vrot.slane %v381_v32, 4  ;;  %v392_v44 = vshrl.u32 %v4660_v28, 16  ;;  %v374_v48 = vor.u32 %v373_v37, %v370_v31  ;;  %v4710_v31 = vld [vmem:[%s4520_s11 + $0x60] sm:$0xf] }
  0x37   : > { %5658 = vst [vmem:[#allocation8_spill] sm:$0xff] %v4669_v34  ;;  %3828 = vmatprep.mubr.msk.bf16.mxu0 %vm681_vm4, %v4669_v34  ;;  %3693 = vmatmul.mubr.msk.bf16.gmra.mrb[4].mxu1 %vm681_vm4, %v4669_v34  ;;  %v366_v47 = vsel %vm4572_vm5, %v361_v35, %v365_v5  ;;  %v395_v50 = vshll.u32 %v4660_v28, 16  ;;  %v401_v51 = vshll.u32 %v4667_v33, 16  ;;  %v389_v58 = vrot.slane %v387_v43, 5  ;;  %v4898_v34 = vld [vmem:[%s4520_s11 + $0xa0] sm:$0xf] }
  0x38   : > { %v4690_v55 = vcombine.low %v356_v10, %v366_v47  ;;  %v384_v57 = vor.u32 %v383_v39, %v379_v38  ;;  %v394_v8 = vrot.slane %v392_v44, 4  ;;  %v375_v62 = vrot.slane %v374_v48, 4  ;;  %v4715_v39 = vld [vmem:[%s4520_s11 + $0x64] sm:$0xf] }
  0x39   : > { %v397_v63 = vrot.slane %v395_v50, 5  ;;  %v403_v1 = vrot.slane %v401_v51, 5  ;;  %v405_v2 = vshrl.u32 %v4667_v33, 16  ;;  %v411_v5 = vshll.u32 %v4683_v49, 16 }
  0x3a   : > { %5660 = vst [vmem:[#allocation10_spill] sm:$0xff] %v4690_v55  ;;  %3696 = vmatprep.mubr.msk.bf16.mxu1 %vm681_vm4, %v4690_v55  ;;  %v385_v3 = vrot.slane %v384_v57, 4  ;;  %v416_v9 = vshrl.u32 %v4688_v54, 16  ;;  %v419_v11 = vshll.u32 %v4688_v54, 16  ;;  %3829 = vmatmul.mubr.msk.bf16.gmra.mrb[4].mxu0 %vm681_vm4, %v4690_v55  ;;  %v380_v17 = vsel %vm4572_vm5, %v375_v62, %v379_v38  ;;  %v4729_v62 = vld [vmem:[%s4520_s11 + $0x68] sm:$0x1] }
  0x3b   : > { %v398_v19 = vor.u32 %v397_v63, %v394_v8  ;;  %v407_v20 = vrot.slane %v405_v2, 4  ;;  %v425_v30 = vshll.u32 %v4693_v59, 16  ;;  %v413_v35 = vrot.slane %v411_v5, 5 }
  0x3c   : > { %v390_v32 = vsel %vm4572_vm5, %v385_v3, %v389_v58  ;;  %v418_v37 = vrot.slane %v416_v9, 4  ;;  %v421_v10 = vrot.slane %v419_v11, 5  ;;  %v429_v50 = vshrl.u32 %v4693_v59, 16 }
  0x3d   : > { %v4717_v43 = vcombine.low %v380_v17, %v390_v32  ;;  %v399_v38 = vrot.slane %v398_v19, 4  ;;  %v408_v44 = vor.u32 %v407_v20, %v403_v1  ;;  %v427_v47 = vrot.slane %v425_v30, 5 }
  0x3e   : > { %v422_v48 = vor.u32 %v421_v10, %v418_v37  ;;  %v435_v51 = vshll.u32 %v4706_v29, 16  ;;  %v440_v57 = vshrl.u32 %v4710_v31, 16  ;;  %v443_v63 = vshll.u32 %v4710_v31, 16 }
  0x3f   : > { %5662 = vst [vmem:[#allocation12_spill] sm:$0xff] %v4717_v43  ;;  %3832 = vmatprep.mubr.msk.bf16.mxu0 %vm681_vm4, %v4717_v43  ;;  %3697 = vmatmul.mubr.msk.bf16.gmra.mrb[8].mxu1 %vm681_vm4, %v4717_v43  ;;  %v404_v58 = vsel %vm4572_vm5, %v399_v38, %v403_v1  ;;  %v409_v8 = vrot.slane %v408_v44, 4  ;;  %v449_v2 = vshll.u32 %v4715_v39, 16  ;;  %v431_v5 = vrot.slane %v429_v50, 4  ;;  %v4737_v1 = vld [vmem:[%s4520_s11 + $0x6c] sm:$0xf] }
  0x40   : > { %v423_v3 = vrot.slane %v422_v48, 4  ;;  %v437_v9 = vrot.slane %v435_v51, 5  ;;  %v442_v11 = vrot.slane %v440_v57, 4  ;;  %v445_v19 = vrot.slane %v443_v63, 5  ;;  %v4753_v57 = vld [vmem:[%s4520_s11 + $0x70] sm:$0xf] }
  0x41   : > { %v414_v17 = vsel %vm4572_vm5, %v409_v8, %v413_v35  ;;  %v451_v20 = vrot.slane %v449_v2, 5  ;;  %v453_v30 = vshrl.u32 %v4715_v39, 16  ;;  %v432_v10 = vor.u32 %v431_v5, %v427_v47 }
  0x42   : > { %v4739_v32 = vcombine.low %v404_v58, %v414_v17  ;;  %v428_v37 = vsel %vm4572_vm5, %v423_v3, %v427_v47  ;;  %v459_v38 = vshll.u32 %v4729_v62, 16  ;;  %v446_v35 = vor.u32 %v445_v19, %v442_v11  ;;  %v4766_v11 = vld [vmem:[%s4520_s11 + $0x74] sm:$0x1] }
  0x43   : > { %v455_v48 = vrot.slane %v453_v30, 4  ;;  %v3304_v50 = vrot.slane %v4545_v21, 9  ;;  %v1218_v51 = vrot.slane %v4548_v23, 5  ;;  %v433_v47 = vrot.slane %v432_v10, 4 }
  0x44   : > { %5663 = vst [vmem:[#allocation13_spill] sm:$0xff] %v4739_v32  ;;  %3833 = vmatmul.mubr.msk.bf16.gmra.mrb[8].mxu0 %vm681_vm4, %v4739_v32  ;;  %3700 = vmatprep.mubr.msk.bf16.mxu1 %vm681_vm4, %v4739_v32  ;;  %v461_v58 = vrot.slane %v459_v38, 5  ;;  %v464_v8 = vshrl.u32 %v4737_v1, 16  ;;  %v467_v63 = vshll.u32 %v4737_v1, 16  ;;  %v447_v2 = vrot.slane %v446_v35, 4 }
  0x45   : > { %v456_v3 = vor.u32 %v455_v48, %v451_v20  ;;  %v1219_v21 = vsel %vm4746_vm8, %v3304_v50, %v1218_v51  ;;  %v1220_v23 = vrot.slane %v1218_v51, 4  ;;  %v438_v5 = vsel %vm4572_vm5, %v433_v47, %v437_v9  ;;  %v4778_v9 = vld [vmem:[%s4520_s11 + $0x78] sm:$0xf] }
  0x46   : > { %v466_v17 = vrot.slane %v464_v8, 4  ;;  %v469_v19 = vrot.slane %v467_v63, 5  ;;  %v473_v30 = vshll.u32 %v4753_v57, 16  ;;  %v4769_v10 = vcombine.low %v428_v37, %v438_v5  ;;  %v4794_v63 = vld [vmem:[%s4520_s11 + $0x7c] sm:$0xf] }
  0x47   : > { %v452_v38 = vsel %vm4572_vm5, %v447_v2, %v451_v20  ;;  %v457_v35 = vrot.slane %v456_v3, 4  ;;  %v1222_v48 = vsel %vm4746_vm8, %v1220_v23, %v1221_v52  ;;  %v477_v8 = vshrl.u32 %v4753_v57, 16  ;;  %v4799_v23 = vld [vmem:[%s4520_s11 + $0x80] sm:$0x1] }
  0x48   : > { %5666 = vst [vmem:[#allocation14_spill] sm:$0xff] %v4769_v10  ;;  %v4780_v50 = vcombine.low %v1219_v21, %v1222_v48  ;;  %v470_v51 = vor.u32 %v469_v19, %v466_v17  ;;  %v475_v47 = vrot.slane %v473_v30, 5  ;;  %3836 = vmatprep.mubr.msk.bf16.mxu0 %vm681_vm4, %v4769_v10  ;;  %3701 = vmatmul.mubr.msk.bf16.gmra.mrb[12].mxu1 %vm681_vm4, %v4769_v10  ;;  %v483_v52 = vshll.u32 %v4766_v11, 16 }
  0x49   : > { %v462_v24 = vsel %vm4572_vm5, %v457_v35, %v461_v58  ;;  %v3305_v20 = vrot.slane %v4568_v40, 9  ;;  %v1227_v37 = vrot.slane %v1225_v12, 4  ;;  %v479_v21 = vrot.slane %v477_v8, 4 }
  0x4a   : > { %5667 = vst [vmem:[#allocation15_spill] sm:$0xff] %v4780_v50  ;;  %v4796_v2 = vcombine.low %v452_v38, %v462_v24  ;;  %v471_v3 = vrot.slane %v470_v51, 4  ;;  %v488_v5 = vshrl.u32 %v4778_v9, 16  ;;  %v485_v17 = vrot.slane %v483_v52, 5  ;;  %v4825_v24 = vld [vmem:[%s4520_s11 + $0x84] sm:$0xf] }
  0x4b   : > { %v1226_v58 = vsel %vm4746_vm8, %v3305_v20, %v1225_v12  ;;  %v1229_v19 = vsel %vm4746_vm8, %v1227_v37, %v1228_v13  ;;  %v491_v30 = vshll.u32 %v4778_v9, 16  ;;  %v480_v35 = vor.u32 %v479_v21, %v475_v47 }
  0x4c   : > { %5668 = vst [vmem:[#allocation16_spill] sm:$0xff] %v4796_v2  ;;  %3837 = vmatmul.mubr.msk.bf16.gmra.mrb[12].mxu0 %vm681_vm4, %v4796_v2  ;;  %3704 = vmatprep.mubr.msk.bf16.mxu1 %vm681_vm4, %v4796_v2  ;;  %v476_v38 = vsel %vm4572_vm5, %v471_v3, %v475_v47  ;;  %v4817_v48 = vcombine.low %v1226_v58, %v1229_v19  ;;  %v490_v12 = vrot.slane %v488_v5, 4  ;;  %v497_v13 = vshll.u32 %v4794_v63, 16  ;;  %v4831_v19 = vld [vmem:[%s4520_s11 + $0x88] sm:$0xf] }
  0x4d   : > { %3858 = vmatprep.mubr.msk.bf16.mxu0 %vm681_vm4, %v4780_v50  ;;  %v493_v53 = vrot.slane %v491_v30, 5  ;;  %v501_v51 = vshrl.u32 %v4794_v63, 16  ;;  %v507_v8 = vshll.u32 %v4799_v23, 16  ;;  %v481_v52 = vrot.slane %v480_v35, 4 }
  0x4e   : > { %5669 = vst [vmem:[#allocation17_spill] sm:$0xff] %v4817_v48  ;;  %v3306_v47 = vrot.slane %v4595_v0, 9  ;;  %v1232_v20 = vrot.slane %v4600_v6, 5  ;;  %v1235_v37 = vrot.slane %v4608_v16, 5  ;;  %v499_v21 = vrot.slane %v497_v13, 5 }
  0x4f   : > { %v494_v3 = vor.u32 %v493_v53, %v490_v12  ;;  %v503_v5 = vrot.slane %v501_v51, 4  ;;  %v509_v58 = vrot.slane %v507_v8, 5  ;;  %v486_v30 = vsel %vm4572_vm5, %v481_v52, %v485_v17  ;;  %v4841_v12 = vld [vmem:[%s4520_s11 + $0x8c] sm:$0x1] }
  0x50   : > { %v1233_v2 = vsel %vm4746_vm8, %v3306_v47, %v1232_v20  ;;  %v1234_v35 = vrot.slane %v1232_v20, 4  ;;  %v512_v10 = vshrl.u32 %v4825_v24, 16  ;;  %v4838_v32 = vcombine.low %v476_v38, %v486_v30 }
  0x51   : > { %v495_v43 = vrot.slane %v494_v3, 4  ;;  %v504_v16 = vor.u32 %v503_v5, %v499_v21  ;;  %v515_v53 = vshll.u32 %v4825_v24, 16  ;;  %v521_v17 = vshll.u32 %v4831_v19, 16  ;;  %v4855_v3 = vld [vmem:[%s4520_s11 + $0x90] sm:$0xf] }
  0x52   : > { %5670 = vst [vmem:[#allocation18_spill] sm:$0xff] %v4838_v32  ;;  %v1236_v13 = vsel %vm4746_vm8, %v1234_v35, %v1235_v37  ;;  %v514_v51 = vrot.slane %v512_v10, 4  ;;  %v525_v8 = vshrl.u32 %v4831_v19, 16  ;;  %3705 = vmatmul.mubr.msk.bf16.gmra.mrb[16].mxu1 %vm681_vm4, %v4838_v32  ;;  %v531_v5 = vshll.u32 %v4841_v12, 16  ;;  %v4891_v32 = vld [vmem:[%s4520_s11 + $0x9c] sm:$0xf] }
  0x53   : > { %v500_v38 = vsel %vm4572_vm5, %v495_v43, %v499_v21  ;;  %v505_v52 = vrot.slane %v504_v16, 4  ;;  %v4852_v47 = vcombine.low %v1233_v2, %v1236_v13  ;;  %v517_v20 = vrot.slane %v515_v53, 5  ;;  %v4869_v16 = vld [vmem:[%s4520_s11 + $0x94] sm:$0xf] }
  0x54   : > { %3859 = vmatmul.mubr.msk.bf16.vlgmr.msra.gmra.mrb[0].mxu0 %vm681_vm4, %v4817_v48  ;;  %v523_v10 = vrot.slane %v521_v17, 5  ;;  %v527_v37 = vrot.slane %v525_v8, 4  ;;  %v3307_v30 = vrot.slane %v4614_v22, 9  ;;  %v1239_v21 = vrot.slane %v4621_v36, 5  ;;  %v4874_v8 = vld [vmem:[%s4520_s11 + $0x98] sm:$0x1] }
  0x55   : > { %5671 = vst [vmem:[#allocation19_spill] sm:$0xff] %v4852_v47  ;;  %3891 = vmatpush3.bf16.msra.mxu0 %v4554_v25  ;;  %v510_v43 = vsel %vm4572_vm5, %v505_v52, %v509_v58  ;;  %3862 = vmatprep.mubr.msk.bf16.mxu0 %vm681_vm4, %v4852_v47  ;;  %v518_v2 = vor.u32 %v517_v20, %v514_v51  ;;  %v1242_v35 = vrot.slane %v4628_v42, 5  ;;  %v533_v17 = vrot.slane %v531_v5, 5 }
  0x56   : > { %v4871_v53 = vcombine.low %v500_v38, %v510_v43  ;;  %v528_v13 = vor.u32 %v527_v37, %v523_v10  ;;  %v536_v25 = vshrl.u32 %v4855_v3, 16  ;;  %3924 = vmatprep.subr.bf16.mxu0 %v4560_v27  ;;  %v1240_v51 = vsel %vm4746_vm8, %v3307_v30, %v1239_v21 }
  0x57   : > { %v519_v58 = vrot.slane %v518_v2, 4  ;;  %v1241_v52 = vrot.slane %v1239_v21, 4  ;;  %v539_v42 = vshll.u32 %v4855_v3, 16  ;;  %v545_v37 = vshll.u32 %v4869_v16, 16 }
  0x58   : > { %5672 = vst [vmem:[#allocation20_spill] sm:$0xff] %v4871_v53  ;;  %3708 = vmatprep.mubr.msk.bf16.mxu1 %vm681_vm4, %v4871_v53  ;;  %v529_v38 = vrot.slane %v528_v13, 4  ;;  %v538_v20 = vrot.slane %v536_v25, 4  ;;  %v549_v5 = vshrl.u32 %v4869_v16, 16  ;;  %v555_v21 = vshll.u32 %v4874_v8, 16 }
  0x59   : > { %v524_v43 = vsel %vm4572_vm5, %v519_v58, %v523_v10  ;;  %v1243_v2 = vsel %vm4746_vm8, %v1241_v52, %v1242_v35  ;;  %v541_v30 = vrot.slane %v539_v42, 5  ;;  %v547_v25 = vrot.slane %v545_v37, 5 }
  0x5a   : > { %v534_v53 = vsel %vm4572_vm5, %v529_v38, %v533_v17  ;;  %v4895_v13 = vcombine.low %v1240_v51, %v1243_v2  ;;  %v551_v55 = vrot.slane %v549_v5, 4  ;;  %v557_v58 = vrot.slane %v555_v21, 5  ;;  %v4911_v38 = vld [vmem:[%s4520_s11 + $0xa4] sm:$0x1] }
  0x5b   : > { %v4900_v61 = vcombine.low %v524_v43, %v534_v53  ;;  %v542_v10 = vor.u32 %v541_v30, %v538_v20  ;;  %v3308_v35 = vrot.slane %v4636_v56, 9  ;;  %v1246_v42 = vrot.slane %v4643_v60, 5 }
  0x5c   : > { %5673 = vst [vmem:[#allocation21_spill] sm:$0xff] %v4895_v13  ;;  %3863 = vmatmul.mubr.msk.bf16.gmra.mrb[4].mxu0 %vm681_vm4, %v4895_v13  ;;  %v552_v52 = vor.u32 %v551_v55, %v547_v25  ;;  %v1249_v17 = vrot.slane %v4655_v18, 5  ;;  %v560_v51 = vshrl.u32 %v4891_v32, 16  ;;  %v563_v20 = vshll.u32 %v4891_v32, 16  ;;  %v4921_v13 = vld [vmem:[%s4520_s11 + $0xa8] sm:$0xf] }
  0x5d   : > { %5674 = vst [vmem:[#allocation22_spill] sm:$0xff] %v4900_v61  ;;  %3709 = vmatmul.mubr.msk.bf16.gmra.mrb[20].mxu1 %vm681_vm4, %v4900_v61  ;;  %v543_v53 = vrot.slane %v542_v10, 4  ;;  %v569_v37 = vshll.u32 %v4898_v34, 16  ;;  %v573_v55 = vshrl.u32 %v4898_v34, 16  ;;  %v1247_v18 = vsel %vm4746_vm8, %v3308_v35, %v1246_v42 }
  0x5e   : > { %v553_v5 = vrot.slane %v552_v52, 4  ;;  %v1248_v43 = vrot.slane %v1246_v42, 4  ;;  %v562_v2 = vrot.slane %v560_v51, 4  ;;  %v565_v21 = vrot.slane %v563_v20, 5  ;;  %v4930_v42 = vld [vmem:[%s4520_s11 + $0xac] sm:$0xf] }
  0x5f   : > { %v548_v30 = vsel %vm4572_vm5, %v543_v53, %v547_v25  ;;  %v571_v10 = vrot.slane %v569_v37, 5  ;;  %v575_v61 = vrot.slane %v573_v55, 4  ;;  %v579_v52 = vshll.u32 %v4911_v38, 16 }
  0x60   : > { %v558_v47 = vsel %vm4572_vm5, %v553_v5, %v557_v58  ;;  %v1250_v7 = vsel %vm4746_vm8, %v1248_v43, %v1249_v17  ;;  %v3309_v35 = vrot.slane %v4660_v28, 9  ;;  %v566_v53 = vor.u32 %v565_v21, %v562_v2 }
  0x61   : > { %v4932_v51 = vcombine.low %v548_v30, %v558_v47  ;;  %v4934_v25 = vcombine.low %v1247_v18, %v1250_v7  ;;  %v576_v20 = vor.u32 %v575_v61, %v571_v10  ;;  %v581_v37 = vrot.slane %v579_v52, 5  ;;  %v4944_v7 = vld [vmem:[%s4520_s11 + $0xb0] sm:$0x1] }
  0x62   : > { %v1253_v55 = vrot.slane %v4667_v33, 5  ;;  %v1256_v58 = vrot.slane %v4683_v49, 5  ;;  %v584_v17 = vshrl.u32 %v4921_v13, 16  ;;  %v567_v47 = vrot.slane %v566_v53, 4 }
  0x63   : > { %5675 = vst [vmem:[#allocation23_spill] sm:$0xff] %v4932_v51  ;;  %5676 = vst [vmem:[#allocation24_spill] sm:$0xff] %v4934_v25  ;;  %3712 = vmatprep.mubr.msk.bf16.mxu1 %vm681_vm4, %v4932_v51  ;;  %3866 = vmatprep.mubr.msk.bf16.mxu0 %vm681_vm4, %v4934_v25  ;;  %v577_v5 = vrot.slane %v576_v20, 4  ;;  %v587_v61 = vshll.u32 %v4921_v13, 16  ;;  %v593_v18 = vshll.u32 %v4930_v42, 16  ;;  %v597_v30 = vshrl.u32 %v4930_v42, 16 }
  0x64   : > { %v1254_v49 = vsel %vm4746_vm8, %v3309_v35, %v1253_v55  ;;  %v1255_v43 = vrot.slane %v1253_v55, 4  ;;  %v586_v2 = vrot.slane %v584_v17, 4  ;;  %v572_v21 = vsel %vm4572_vm5, %v567_v47, %v571_v10  ;;  %v4956_v51 = vld [vmem:[%s4520_s11 + $0xb4] sm:$0xf]  ;;  %v4968_v47 = vld [vmem:[%s4520_s11 + $0xb8] sm:$0xf] }
  0x65   : > { %v582_v52 = vsel %vm4572_vm5, %v577_v5, %v581_v37  ;;  %v589_v53 = vrot.slane %v587_v61, 5  ;;  %v595_v20 = vrot.slane %v593_v18, 5  ;;  %v599_v55 = vrot.slane %v597_v30, 4 }
  0x66   : > { %v4958_v25 = vcombine.low %v572_v21, %v582_v52  ;;  %v1257_v35 = vsel %vm4746_vm8, %v1255_v43, %v1256_v58  ;;  %v603_v17 = vshll.u32 %v4944_v7, 16  ;;  %v3310_v10 = vrot.slane %v4688_v54, 9  ;;  %v4974_v58 = vld [vmem:[%s4520_s11 + $0xbc] sm:$0x1] }
  0x67   : > { %v4963_v48 = vcombine.low %v1254_v49, %v1257_v35  ;;  %v590_v50 = vor.u32 %v589_v53, %v586_v2  ;;  %v1260_v37 = vrot.slane %v4693_v59, 5  ;;  %v600_v5 = vor.u32 %v599_v55, %v595_v20 }
  0x68   : > { %5677 = vst [vmem:[#allocation25_spill] sm:$0xff] %v4958_v25  ;;  %3713 = vmatmul.mubr.msk.bf16.gmra.mrb[24].mxu1 %vm681_vm4, %v4958_v25  ;;  %v605_v61 = vrot.slane %v603_v17, 5  ;;  %v1263_v18 = vrot.slane %v4706_v29, 5  ;;  %v608_v43 = vshrl.u32 %v4956_v51, 16  ;;  %v611_v21 = vshll.u32 %v4956_v51, 16 }
  0x69   : > { %5678 = vst [vmem:[#allocation26_spill] sm:$0xff] %v4963_v48  ;;  %3867 = vmatmul.mubr.msk.bf16.gmra.mrb[8].mxu0 %vm681_vm4, %v4963_v48  ;;  %v591_v49 = vrot.slane %v590_v50, 4  ;;  %v1261_v2 = vsel %vm4746_vm8, %v3310_v10, %v1260_v37  ;;  %v1262_v30 = vrot.slane %v1260_v37, 4  ;;  %v601_v52 = vrot.slane %v600_v5, 4 }
  0x6a   : > { %v610_v53 = vrot.slane %v608_v43, 4  ;;  %v617_v35 = vshll.u32 %v4968_v47, 16  ;;  %v621_v29 = vshrl.u32 %v4968_v47, 16  ;;  %v613_v25 = vrot.slane %v611_v21, 5 }
  0x6b   : > { %v596_v55 = vsel %vm4572_vm5, %v591_v49, %v595_v20  ;;  %v1264_v17 = vsel %vm4746_vm8, %v1262_v30, %v1263_v18  ;;  %v627_v50 = vshll.u32 %v4974_v58, 16  ;;  %v606_v10 = vsel %vm4572_vm5, %v601_v52, %v605_v61 }
  0x6c   : > { %v4991_v37 = vcombine.low %v1261_v2, %v1264_v17  ;;  %v619_v5 = vrot.slane %v617_v35, 5  ;;  %v623_v43 = vrot.slane %v621_v29, 4  ;;  %v4993_v48 = vcombine.low %v596_v55, %v606_v10 }
  0x6d   : > { %v614_v27 = vor.u32 %v613_v25, %v610_v53  ;;  %v629_v54 = vrot.slane %v627_v50, 5  ;;  %v3311_v59 = vrot.slane %v4710_v31, 9  ;;  %v1267_v18 = vrot.slane %v4715_v39, 5 }
  0x6e   : > { %3870 = vmatprep.mubr.msk.bf16.mxu0 %vm681_vm4, %v4991_v37  ;;  %v624_v20 = vor.u32 %v623_v43, %v619_v5  ;;  %v1270_v49 = vrot.slane %v4729_v62, 5  ;;  %v3312_v61 = vrot.slane %v4737_v1, 9  ;;  %3716 = vmatprep.mubr.msk.bf16.mxu1 %vm681_vm4, %v4993_v48  ;;  %v3271_v25 = vcombine.low %v4532_v14, %v4535_v15 }
  0x6f   : > { %v615_v2 = vrot.slane %v614_v27, 4  ;;  %v1274_v30 = vrot.slane %v4753_v57, 5  ;;  %v1277_v21 = vrot.slane %v4766_v11, 5  ;;  %v1268_v53 = vsel %vm4746_vm8, %v3311_v59, %v1267_v18 }
  0x70   : > { %v625_v52 = vrot.slane %v624_v20, 4  ;;  %v1269_v35 = vrot.slane %v1267_v18, 4  ;;  %v1281_v62 = vrot.slane %v4794_v63, 5  ;;  %v3313_v14 = vrot.slane %v4778_v9, 9 }
  0x71   : > { %v620_v29 = vsel %vm4572_vm5, %v615_v2, %v619_v5  ;;  %v1275_v27 = vsel %vm4746_vm8, %v3312_v61, %v1274_v30  ;;  %v1276_v55 = vrot.slane %v1274_v30, 4  ;;  %v1284_v59 = vrot.slane %v4799_v23, 5 }
  0x72   : > { %v630_v15 = vsel %vm4572_vm5, %v625_v52, %v629_v54  ;;  %v1271_v11 = vsel %vm4746_vm8, %v1269_v35, %v1270_v49  ;;  %v1283_v17 = vrot.slane %v1281_v62, 4  ;;  %v3314_v20 = vrot.slane %v4825_v24, 9 }
  0x73   : > { %v5020_v50 = vcombine.low %v620_v29, %v630_v15  ;;  %v5022_v10 = vcombine.low %v1268_v53, %v1271_v11  ;;  %v1278_v5 = vsel %vm4746_vm8, %v1276_v55, %v1277_v21  ;;  %v1288_v18 = vrot.slane %v4831_v19, 5 }
  0x74   : > { %v5026_v43 = vcombine.low %v1275_v27, %v1278_v5  ;;  %v1291_v54 = vrot.slane %v4841_v12, 5  ;;  %v1282_v23 = vsel %vm4746_vm8, %v3313_v14, %v1281_v62  ;;  %v1285_v49 = vsel %vm4746_vm8, %v1283_v17, %v1284_v59 }
  0x75   : > { %3717 = vmatmul.mubr.msk.bf16.gmra.mrb[28].mxu1 %vm681_vm4, %v5020_v50  ;;  %3871 = vmatmul.mubr.msk.bf16.gmra.mrb[12].mxu0 %vm681_vm4, %v5022_v10  ;;  %v1290_v61 = vrot.slane %v1288_v18, 4  ;;  %v1295_v2 = vrot.slane %v4869_v16, 5  ;;  %v1302_v30 = vrot.slane %v4898_v34, 5  ;;  %v1289_v21 = vsel %vm4746_vm8, %v3314_v20, %v1288_v18 }
  0x76   : > { %3722 = vmatprep.mubr.msk.bf16.mxu1 %vm681_vm4, %v3271_v25  ;;  %3874 = vmatprep.mubr.msk.bf16.mxu0 %vm681_vm4, %v5026_v43  ;;  %v5048_v25 = vcombine.low %v1282_v23, %v1285_v49  ;;  %v3315_v52 = vrot.slane %v4855_v3, 9  ;;  %v1298_v35 = vrot.slane %v4874_v8, 5  ;;  %v5054_v62 = vcombine.low %v4568_v40, %v4581_v46 }
  0x77   : > { %v1292_v12 = vsel %vm4746_vm8, %v1290_v61, %v1291_v54  ;;  %v1297_v53 = vrot.slane %v1295_v2, 4  ;;  %v3316_v29 = vrot.slane %v4891_v32, 9  ;;  %v1304_v55 = vrot.slane %v1302_v30, 4 }
  0x78   : > { %v5057_v27 = vcombine.low %v1289_v21, %v1292_v12  ;;  %v1305_v14 = vrot.slane %v4911_v38, 5  ;;  %v1309_v15 = vrot.slane %v4930_v42, 5  ;;  %v1296_v8 = vsel %vm4746_vm8, %v3315_v52, %v1295_v2 }
  0x79   : > { %v1299_v40 = vsel %vm4746_vm8, %v1297_v53, %v1298_v35  ;;  %v5074_v46 = vcombine.low %v4595_v0, %v4600_v6  ;;  %v1303_v38 = vsel %vm4746_vm8, %v3316_v29, %v1302_v30  ;;  %v3317_v11 = vrot.slane %v4921_v13, 9 }
  0x7a   : > { %v5081_v17 = vcombine.low %v4710_v31, %v4715_v39  ;;  %v1316_v59 = vrot.slane %v4968_v47, 5  ;;  %v5090_v0 = vcombine.low %v4737_v1, %v4753_v57  ;;  %v5094_v6 = vcombine.low %v4778_v9, %v4794_v63  ;;  %v3352_v31 = vld [vmem:[%s5615_s1 + $0x6] sm:$0x3] }
  0x7b   : > { %v5099_v39 = vcombine.low %v1296_v8, %v1299_v40  ;;  %v1311_v5 = vrot.slane %v1309_v15, 4  ;;  %v1312_v20 = vrot.slane %v4944_v7, 5  ;;  %v5104_v18 = vcombine.low %v4825_v24, %v4831_v19 }
  0x7c   : > { %v5108_v1 = vcombine.low %v4855_v3, %v4869_v16  ;;  %v5112_v57 = vcombine.low %v4891_v32, %v4898_v34  ;;  %v5116_v9 = vcombine.low %v4921_v13, %v4930_v42  ;;  %v5120_v63 = vcombine.low %v4956_v51, %v4968_v47  ;;  %v5134_v13 = vld [vmem:[%s4520_s11 + $0xc4] sm:$0xf]  ;;  %v5155_v47 = vld [vmem:[%s4520_s11 + $0xc0] sm:$0xf] }
  0x7d   : > { %3723 = vmatmul.mubr.msk.bf16.vlgmr.msra.gmra.mrb[0].mxu1 %vm681_vm4, %v4578_v45  ;;  %3875 = vmatmul.mubr.msk.bf16.gmra.mrb[16].mxu0 %vm681_vm4, %v5048_v25  ;;  %v5124_v24 = vcombine.low %v4614_v22, %v4621_v36  ;;  %v5129_v3 = vand.u32 %v3352_v31, %v4496_v4  ;;  %v3318_v34 = vrot.slane %v4956_v51, 9  ;;  %v1318_v32 = vrot.slane %v1316_v59, 4 }
  0x7e   : > { %3755 = vmatpush3.bf16.msra.mxu1 %v4557_v26  ;;  %3726 = vmatprep.mubr.msk.bf16.mxu1 %vm681_vm4, %v5054_v62  ;;  %v1306_v26 = vsel %vm4746_vm8, %v1304_v55, %v1305_v14  ;;  %v1319_v16 = vrot.slane %v4974_v58, 5  ;;  %v1310_v22 = vsel %vm4746_vm8, %v3317_v11, %v1309_v15  ;;  %v1313_v36 = vsel %vm4746_vm8, %v1311_v5, %v1312_v20  ;;  %v239_v58 = vld [vmem:[%s4520_s11 + $0xc8] sm:$0x1] }
  0x7f   : > { %3878 = vmatprep.mubr.msk.bf16.mxu0 %vm681_vm4, %v5057_v27  ;;  %v5126_v19 = vcombine.low %v1303_v38, %v1306_v26  ;;  %3788 = vmatprep.subr.bf16.mxu1 %v5129_v3  ;;  %v2052_v42 = vrot.slane %v5134_v13, 5  ;;  %v1317_v51 = vsel %vm4746_vm8, %v3318_v34, %v1316_v59  ;;  %v5160_v54 = vcombine.low %v4636_v56, %v4643_v60  ;;  %v5679_v26 = vld [vmem:[#allocation11_spill] sm:$0xff]  ;;  %v5680_v59 = vld [vmem:[#allocation9_spill] sm:$0xff] }
  0x80   : > { %v1320_v7 = vsel %vm4746_vm8, %v1318_v32, %v1319_v16  ;;  %v5162_v23 = vcombine.low %v1310_v22, %v1313_v36  ;;  %v5166_v49 = vcombine.low %v4660_v28, %v4667_v33  ;;  %v1822_v61 = vshrl.u32 %v5155_v47, 16  ;;  %v3444_v16 = vld [vmem:[%s5615_s1 + $0x10] sm:$0x3]  ;;  %v5681_v36 = vld [vmem:[#allocation6_spill] sm:$0xff] }
  0x81   : > { %v1825_v2 = vshll.u32 %v5155_v47, 16  ;;  %v1831_v30 = vshll.u32 %v5134_v13, 16  ;;  %v1835_v21 = vshrl.u32 %v5134_v13, 16  ;;  %v5172_v12 = vcombine.low %v1317_v51, %v1320_v7  ;;  %v4328_v51 = vld [vmem:[%s4520_s11 + $0x8] sm:$0x1] }
  0x82   : > { %v3388_v52 = vrot.slane %v5155_v47, 9  ;;  %v2054_v56 = vrot.slane %v2052_v42, 4  ;;  %v2055_v60 = vrot.slane %v239_v58, 5  ;;  %v1824_v53 = vrot.slane %v1822_v61, 4 }
  0x83   : > { %v1827_v35 = vrot.slane %v1825_v2, 5  ;;  %v1833_v29 = vrot.slane %v1831_v30, 5  ;;  %v1837_v55 = vrot.slane %v1835_v21, 4  ;;  %v1841_v14 = vshll.u32 %v239_v58, 16  ;;  %v4329_v58 = vld [vmem:[%s4520_s11] sm:$0xf] }
  0x84   : > { %v2053_v15 = vsel %vm4746_vm8, %v3388_v52, %v2052_v42  ;;  %v2056_v8 = vsel %vm4746_vm8, %v2054_v56, %v2055_v60  ;;  %v5189_v31 = vcombine.low %v5680_v59, %v5679_v26  ;;  %v2712_v22 = vand.u32 %v3444_v16, %v4496_v4  ;;  %v4327_v4 = vld [vmem:[%s4520_s11 + $0x4] sm:$0xf]  ;;  %v5683_v60 = vld [vmem:[#allocation17_spill] sm:$0xff]  ;;  %v5695_v26 = vld [vmem:[#allocation16_spill] sm:$0xff] }
  0x85   : > { %3727 = vmatmul.mubr.msk.bf16.gmra.mrb[4].mxu1 %vm681_vm4, %v5074_v46  ;;  %3879 = vmatmul.mubr.msk.bf16.gmra.mrb[20].mxu0 %vm681_vm4, %v5099_v39  ;;  %v1828_v28 = vor.u32 %v1827_v35, %v1824_v53  ;;  %v1838_v33 = vor.u32 %v1837_v55, %v1833_v29  ;;  %v1843_v11 = vrot.slane %v1841_v14, 5  ;;  %v5191_v5 = vcombine.low %v2053_v15, %v2056_v8  ;;  %v5682_v56 = vld [vmem:[#allocation15_spill] sm:$0xff]  ;;  %v5684_v53 = vld [vmem:[#allocation5_spill] sm:$0xff]  ;;  %v5687_v55 = vld [vmem:[#allocation24_spill] sm:$0xff] }
  0x86   : > { %3730 = vmatprep.mubr.msk.bf16.mxu1 %vm681_vm4, %v5124_v24  ;;  %3882 = vmatprep.mubr.msk.bf16.mxu0 %vm681_vm4, %v5126_v19  ;;  %v1211_v42 = vrot.slane %v4327_v4, 5  ;;  %v1214_v7 = vrot.slane %v4328_v51, 5  ;;  %v3303_v61 = vrot.slane %v4329_v58, 9  ;;  %v5685_v35 = vld [vmem:[#allocation19_spill] sm:$0xff]  ;;  %v5284_v14 = vld [vmem:[%s4520_s11 + $0xd0] sm:$0xf] }
  0x87   : > { %v1829_v40 = vrot.slane %v1828_v28, 4  ;;  %v1839_v38 = vrot.slane %v1838_v33, 4  ;;  %v5688_v28 = vld [vmem:[#allocation26_spill] sm:$0xff]  ;;  %v5281_v33 = vld [vmem:[%s4520_s11 + $0xcc] sm:$0xf]  ;;  %v5699_v4 = vld [vmem:[#allocation23_spill] sm:$0xff] }
  0x88   : > { %v1213_v2 = vrot.slane %v1211_v42, 4  ;;  %v1212_v30 = vsel %vm4746_vm8, %v3303_v61, %v1211_v42  ;;  %v5690_v15 = vld [vmem:[#allocation8_spill] sm:$0xff]  ;;  %v5691_v8 = vld [vmem:[#allocation10_spill] sm:$0xff]  ;;  %v2468_v16 = vshrl.u32 %v5281_v33, 16  ;;  %v242_v58 = vld [vmem:[%s4520_s11 + $0xd4] sm:$0x1] }
  0x89   : > { %v1834_v20 = vsel %vm4572_vm5, %v1829_v40, %v1833_v29  ;;  %v1844_v34 = vsel %vm4572_vm5, %v1839_v38, %v1843_v11  ;;  %v5686_v29 = vld [vmem:[#allocation21_spill] sm:$0xff]  ;;  %v5692_v40 = vld [vmem:[#allocation12_spill] sm:$0xff]  ;;  %v5694_v11 = vld [vmem:[#allocation14_spill] sm:$0xff]  ;;  %v2698_v41 = vrot.slane %v5284_v14, 5  ;;  %s3156_s11 = sshll.u32 %s5457_s9, 4  ;;  %s5558_s11 = int_to_ptr.vmem [resolvable:$true] %s3156_s11 }
  0x8a   : > { %v5197_v32 = vcombine.low %v1834_v20, %v1844_v34  ;;  %v1215_v21 = vsel %vm4746_vm8, %v1213_v2, %v1214_v7  ;;  %v5693_v38 = vld [vmem:[#allocation13_spill] sm:$0xff]  ;;  %v5696_v59 = vld [vmem:[#allocation18_spill] sm:$0xff]  ;;  %v5697_v20 = vld [vmem:[#allocation20_spill] sm:$0xff]  ;;  %s4330_s23 = scalar_lea.vmem %s5558_s11, 2048  ;;  %p4337_p1 = scmp.lt.s32.totalorder %s5558_s11, %s4335_s27 }
  0x8b   : > { %v3320_v52 = vcombine.low %v1212_v30, %v1215_v21  ;;  %v5698_v34 = vld [vmem:[#allocation22_spill] sm:$0xff]  ;;  %v5700_v61 = vld [vmem:[#allocation25_spill] sm:$0xff]  ;;  %v2487_v30 = vshll.u32 %v242_v58, 16  ;;  %p4331_p12 = scmp.ne.s32.totalorder %s5558_s11, %s4330_s23  ;;  %p4338_p2 = scmp.lt.s32.totalorder %s4336_s28, %s4330_s23 }
  0x8d   : > { %3731 = vmatmul.mubr.msk.bf16.gmra.mrb[8].mxu1 %vm681_vm4, %v5160_v54  ;;  %3883 = vmatmul.mubr.msk.bf16.gmra.mrb[24].mxu0 %vm681_vm4, %v5162_v23  ;;  %p4332_p13 = pnand %p4331_p12, %p4474_p4  ;;  %p4339_p3 = por %p4338_p2, %p4337_p1 }
  0x8e   : > { %3734 = vmatprep.mubr.msk.bf16.mxu1 %vm681_vm4, %v5166_v49  ;;  %3886 = vmatprep.mubr.msk.bf16.mxu0 %vm681_vm4, %v5172_v12 }
  0x8f   : > { %p4333_p0 = pneg %p4332_p13 }
  0x91   : > { %p4340_p5 = pnand %p4339_p3, %p4333_p0 }
  0x95   : > { %3735 = vmatmul.mubr.msk.bf16.gmra.mrb[12].mxu1 %vm681_vm4, %v5189_v31  ;;  %3887 = vmatmul.mubr.msk.bf16.gmra.mrb[28].mxu0 %vm681_vm4, %v5191_v5 }
  0x96   : > { %3738 = vmatprep.mubr.msk.bf16.mxu1 %vm681_vm4, %v5081_v17  ;;  %3892 = vmatprep.mubr.msk.bf16.mxu0 %vm681_vm4, %v5054_v62 }
  0x9d   : > { %3739 = vmatmul.mubr.msk.bf16.gmra.mrb[16].mxu1 %vm681_vm4, %v5090_v0  ;;  %3893 = vmatmul.mubr.msk.bf16.vlgmr.msra.gmra.mrb[0].mxu0 %vm681_vm4, %v5074_v46 }
  0x9e   : > { %3925 = vmatpush3.bf16.msra.mxu0 %v5681_v36  ;;  %3742 = vmatprep.mubr.msk.bf16.mxu1 %vm681_vm4, %v5094_v6  ;;  %v2481_v36 = vshrl.u32 %v5284_v14, 16 }
  0x9f   : > { %3896 = vmatprep.mubr.msk.bf16.mxu0 %vm681_vm4, %v5124_v24  ;;  %3958 = vmatprep.subr.bf16.mxu0 %v2712_v22 }
  0xa0   : > { %v2483_v7 = vrot.slane %v2481_v36, 4 }
  0xa5   : > { %3743 = vmatmul.mubr.msk.bf16.gmra.mrb[20].mxu1 %vm681_vm4, %v5104_v18  ;;  %3897 = vmatmul.mubr.msk.bf16.gmra.mrb[4].mxu0 %vm681_vm4, %v5160_v54 }
  0xa6   : > { %3746 = vmatprep.mubr.msk.bf16.mxu1 %vm681_vm4, %v5108_v1  ;;  %3900 = vmatprep.mubr.msk.bf16.mxu0 %vm681_vm4, %v5166_v49 }
  0xad   : > { %3747 = vmatmul.mubr.msk.bf16.gmra.mrb[24].mxu1 %vm681_vm4, %v5112_v57  ;;  %3901 = vmatmul.mubr.msk.bf16.gmra.mrb[8].mxu0 %vm681_vm4, %v5189_v31 }
  0xae   : > { %3750 = vmatprep.mubr.msk.bf16.mxu1 %vm681_vm4, %v5116_v9  ;;  %3904 = vmatprep.mubr.msk.bf16.mxu0 %vm681_vm4, %v5081_v17 }
  0xb5   : > { %3751 = vmatmul.mubr.msk.bf16.gmra.mrb[28].mxu1 %vm681_vm4, %v5120_v63  ;;  %3905 = vmatmul.mubr.msk.bf16.gmra.mrb[12].mxu0 %vm681_vm4, %v5090_v0 }
  0xb6   : > { %3756 = vmatprep.mubr.msk.bf16.mxu1 %vm681_vm4, %v3320_v52  ;;  %3908 = vmatprep.mubr.msk.bf16.mxu0 %vm681_vm4, %v5094_v6 }
  0xbd   : > { %3757 = vmatmul.mubr.msk.bf16.vlgmr.msra.gmra.mrb[0].mxu1 %vm681_vm4, %v5682_v56  ;;  %3909 = vmatmul.mubr.msk.bf16.gmra.mrb[16].mxu0 %vm681_vm4, %v5104_v18  ;;  %v2489_v56 = vrot.slane %v2487_v30, 5 }
  0xbe   : > { %3789 = vmatpush3.bf16.msra.mxu1 %v5129_v3  ;;  %3760 = vmatprep.mubr.msk.bf16.mxu1 %vm681_vm4, %v5683_v60  ;;  %v5270_v3 = vcombine.low %v5155_v47, %v5134_v13  ;;  %v3408_v13 = vcombine.low %v5281_v33, %v5284_v14  ;;  %v5689_v47 = vld [vmem:[#allocation7_spill] sm:$0xff] }
  0xbf   : > { %3912 = vmatprep.mubr.msk.bf16.mxu0 %vm681_vm4, %v5108_v1  ;;  %3992 = vmatprep.subr.bf16.mxu1 %v5684_v53 }
  0xc5   : > { %3761 = vmatmul.mubr.msk.bf16.gmra.mrb[4].mxu1 %vm681_vm4, %v5685_v35  ;;  %3913 = vmatmul.mubr.msk.bf16.gmra.mrb[20].mxu0 %vm681_vm4, %v5112_v57 }
  0xc6   : > { %3764 = vmatprep.mubr.msk.bf16.mxu1 %vm681_vm4, %v5686_v29  ;;  %3916 = vmatprep.mubr.msk.bf16.mxu0 %vm681_vm4, %v5116_v9 }
  0xcd   : > { %3765 = vmatmul.mubr.msk.bf16.gmra.mrb[8].mxu1 %vm681_vm4, %v5687_v55  ;;  %3917 = vmatmul.mubr.msk.bf16.gmra.mrb[24].mxu0 %vm681_vm4, %v5120_v63 }
  0xce   : > { %3768 = vmatprep.mubr.msk.bf16.mxu1 %vm681_vm4, %v5688_v28  ;;  %3920 = vmatprep.mubr.msk.bf16.mxu0 %vm681_vm4, %v5270_v3 }
  0xd5   : > { %3769 = vmatmul.mubr.msk.bf16.gmra.mrb[12].mxu1 %vm681_vm4, %v4991_v37  ;;  %3921 = vmatmul.mubr.msk.bf16.gmra.mrb[28].mxu0 %vm681_vm4, %v3408_v13 }
  0xd6   : > { %3772 = vmatprep.mubr.msk.bf16.mxu1 %vm681_vm4, %v5022_v10  ;;  %3926 = vmatprep.mubr.msk.bf16.mxu0 %vm681_vm4, %v5689_v47 }
  0xdd   : > { %3773 = vmatmul.mubr.msk.bf16.gmra.mrb[16].mxu1 %vm681_vm4, %v5026_v43  ;;  %3927 = vmatmul.mubr.msk.bf16.vlgmr.msra.gmra.mrb[0].mxu0 %vm681_vm4, %v5690_v15 }
  0xde   : > { %3959 = vmatpush3.bf16.msra.mxu0 %v2712_v22  ;;  %3776 = vmatprep.mubr.msk.bf16.mxu1 %vm681_vm4, %v5048_v25  ;;  %v2471_v22 = vshll.u32 %v5281_v33, 16 }
  0xdf   : > { %3930 = vmatprep.mubr.msk.bf16.mxu0 %vm681_vm4, %v5691_v8 }
  0xe0   : > { %v2473_v42 = vrot.slane %v2471_v22, 5 }
  0xe5   : > { %3777 = vmatmul.mubr.msk.bf16.gmra.mrb[20].mxu1 %vm681_vm4, %v5057_v27  ;;  %3931 = vmatmul.mubr.msk.bf16.gmra.mrb[4].mxu0 %vm681_vm4, %v5692_v40 }
  0xe6   : > { %3780 = vmatprep.mubr.msk.bf16.mxu1 %vm681_vm4, %v5099_v39  ;;  %3934 = vmatprep.mubr.msk.bf16.mxu0 %vm681_vm4, %v5693_v38 }
  0xed   : > { %3781 = vmatmul.mubr.msk.bf16.gmra.mrb[24].mxu1 %vm681_vm4, %v5126_v19  ;;  %3935 = vmatmul.mubr.msk.bf16.gmra.mrb[8].mxu0 %vm681_vm4, %v5694_v11 }
  0xee   : > { %3784 = vmatprep.mubr.msk.bf16.mxu1 %vm681_vm4, %v5162_v23  ;;  %3938 = vmatprep.mubr.msk.bf16.mxu0 %vm681_vm4, %v5695_v26 }
  0xf5   : > { %3785 = vmatmul.mubr.msk.bf16.gmra.mrb[28].mxu1 %vm681_vm4, %v5172_v12  ;;  %3939 = vmatmul.mubr.msk.bf16.gmra.mrb[12].mxu0 %vm681_vm4, %v5696_v59 }
  0xf6   : > { %3790 = vmatprep.mubr.msk.bf16.mxu1 %vm681_vm4, %v4578_v45  ;;  %3942 = vmatprep.mubr.msk.bf16.mxu0 %vm681_vm4, %v5697_v20  ;;  %v2477_v45 = vshll.u32 %v5284_v14, 16 }
  0xf8   : > { %v2479_v51 = vrot.slane %v2477_v45, 5 }
  0xfa   : > { %v2484_v2 = vor.u32 %v2483_v7, %v2479_v51 }
  0xfc   : > { %v2485_v52 = vrot.slane %v2484_v2, 4 }
  0xfd   : > { %3791 = vmatmul.mubr.msk.bf16.vlgmr.msra.gmra.mrb[0].mxu1 %vm681_vm4, %v5054_v62  ;;  %3943 = vmatmul.mubr.msk.bf16.gmra.mrb[16].mxu0 %vm681_vm4, %v5698_v34  ;;  %v2470_v62 = vrot.slane %v2468_v16, 4 }
  0xfe   : > { %3993 = vmatpush3.bf16.msra.mxu1 %v5684_v53  ;;  %3794 = vmatprep.mubr.msk.bf16.mxu1 %vm681_vm4, %v5074_v46 }
  0xff   : > { %3946 = vmatprep.mubr.msk.bf16.mxu0 %vm681_vm4, %v5699_v4  ;;  %v2474_v46 = vor.u32 %v2473_v42, %v2470_v62 }
 0x101   : > { %v2475_v21 = vrot.slane %v2474_v46, 4 }
 0x105   : > { %3795 = vmatmul.mubr.msk.bf16.gmra.mrb[4].mxu1 %vm681_vm4, %v5124_v24  ;;  %3947 = vmatmul.mubr.msk.bf16.gmra.mrb[20].mxu0 %vm681_vm4, %v5700_v61  ;;  %v2480_v24 = vsel %vm4572_vm5, %v2475_v21, %v2479_v51 }
 0x106   : > { %3798 = vmatprep.mubr.msk.bf16.mxu1 %vm681_vm4, %v5160_v54  ;;  %3950 = vmatprep.mubr.msk.bf16.mxu0 %vm681_vm4, %v4993_v48  ;;  %v2490_v54 = vsel %vm4572_vm5, %v2485_v52, %v2489_v56 }
 0x107   : > { %v3426_v53 = vcombine.low %v2480_v24, %v2490_v54 }
 0x10d   : > { %3799 = vmatmul.mubr.msk.bf16.gmra.mrb[8].mxu1 %vm681_vm4, %v5166_v49  ;;  %3951 = vmatmul.mubr.msk.bf16.gmra.mrb[24].mxu0 %vm681_vm4, %v5020_v50 }
 0x10e   : > { %3802 = vmatprep.mubr.msk.bf16.mxu1 %vm681_vm4, %v5189_v31  ;;  %3954 = vmatprep.mubr.msk.bf16.mxu0 %vm681_vm4, %v5197_v32 }
 0x115   : > { %3803 = vmatmul.mubr.msk.bf16.gmra.mrb[12].mxu1 %vm681_vm4, %v5081_v17  ;;  %3955 = vmatmul.mubr.msk.bf16.gmra.mrb[28].mxu0 %vm681_vm4, %v3426_v53 }
 0x116   : > { %3806 = vmatprep.mubr.msk.bf16.mxu1 %vm681_vm4, %v5090_v0  ;;  %3960 = vmatprep.mubr.msk.bf16.mxu0 %vm681_vm4, %v5683_v60 }
 0x11d   : > { %3807 = vmatmul.mubr.msk.bf16.gmra.mrb[16].mxu1 %vm681_vm4, %v5094_v6  ;;  %3961 = vmatmul.mubr.msk.bf16.vlgmr.msra.gmra.mrb[0].mxu0 %vm681_vm4, %v5685_v35 }
 0x11e   : > { %3810 = vmatprep.mubr.msk.bf16.mxu1 %vm681_vm4, %v5104_v18  ;;  %3964 = vmatprep.mubr.msk.bf16.mxu0 %vm681_vm4, %v5686_v29 }
 0x125   : > { %3811 = vmatmul.mubr.msk.bf16.gmra.mrb[20].mxu1 %vm681_vm4, %v5108_v1  ;;  %3965 = vmatmul.mubr.msk.bf16.gmra.mrb[4].mxu0 %vm681_vm4, %v5687_v55 }
 0x126   : > { %3814 = vmatprep.mubr.msk.bf16.mxu1 %vm681_vm4, %v5112_v57  ;;  %3968 = vmatprep.mubr.msk.bf16.mxu0 %vm681_vm4, %v5688_v28 }
 0x12d   : > { %3815 = vmatmul.mubr.msk.bf16.gmra.mrb[24].mxu1 %vm681_vm4, %v5116_v9  ;;  %3969 = vmatmul.mubr.msk.bf16.gmra.mrb[8].mxu0 %vm681_vm4, %v4991_v37  ;;  %v3443_v37 = vrot.slane %v5281_v33, 9 }
 0x12e   : > { %3818 = vmatprep.mubr.msk.bf16.mxu1 %vm681_vm4, %v5120_v63  ;;  %3972 = vmatprep.mubr.msk.bf16.mxu0 %vm681_vm4, %v5022_v10  ;;  %v2700_v10 = vrot.slane %v2698_v41, 4 }
 0x135   : > { %3819 = vmatmul.mubr.msk.bf16.gmra.mrb[28].mxu1 %vm681_vm4, %v5270_v3  ;;  %3973 = vmatmul.mubr.msk.bf16.gmra.mrb[12].mxu0 %vm681_vm4, %v5026_v43  ;;  %v2701_v43 = vrot.slane %v242_v58, 5 }
 0x136   : > { %3840 = vmatprep.mubr.msk.bf16.mxu1 %vm681_vm4, %v5696_v59  ;;  %3976 = vmatprep.mubr.msk.bf16.mxu0 %vm681_vm4, %v5048_v25  ;;  %v2699_v25 = vsel %vm4746_vm8, %v3443_v37, %v2698_v41 }
 0x13d   : > { %3841 = vmatmul.mubr.msk.bf16.vlgmr.msra.gmra.mrb[16].mxu1 %vm681_vm4, %v5697_v20  ;;  %3977 = vmatmul.mubr.msk.bf16.gmra.mrb[16].mxu0 %vm681_vm4, %v5057_v27  ;;  %v2702_v27 = vsel %vm4746_vm8, %v2700_v10, %v2701_v43 }
 0x13e   : > { %3844 = vmatprep.mubr.msk.bf16.mxu1 %vm681_vm4, %v5698_v34  ;;  %3980 = vmatprep.mubr.msk.bf16.mxu0 %vm681_vm4, %v5099_v39  ;;  %v3445_v17 = vcombine.low %v2699_v25, %v2702_v27 }
 0x145   : > { %3845 = vmatmul.mubr.msk.bf16.gmra.mrb[20].mxu1 %vm681_vm4, %v5699_v4  ;;  %3981 = vmatmul.mubr.msk.bf16.gmra.mrb[20].mxu0 %vm681_vm4, %v5126_v19 }
 0x146   : > { %3848 = vmatprep.mubr.msk.bf16.mxu1 %vm681_vm4, %v5700_v61  ;;  %3984 = vmatprep.mubr.msk.bf16.mxu0 %vm681_vm4, %v5162_v23 }
 0x14d   : > { %3849 = vmatmul.mubr.msk.bf16.gmra.mrb[24].mxu1 %vm681_vm4, %v4993_v48  ;;  %3985 = vmatmul.mubr.msk.bf16.gmra.mrb[24].mxu0 %vm681_vm4, %v5172_v12 }
 0x14e   : > { %3852 = vmatprep.mubr.msk.bf16.mxu1 %vm681_vm4, %v5020_v50  ;;  %3988 = vmatprep.mubr.msk.bf16.mxu0 %vm681_vm4, %v5191_v5 }
 0x155   : > { %3853 = vmatmul.mubr.msk.bf16.gmra.mrb[28].mxu1 %vm681_vm4, %v5197_v32  ;;  %3989 = vmatmul.mubr.msk.bf16.gmra.mrb[28].mxu0 %vm681_vm4, %v3445_v17  ;;  %v5449_v32 = vld [vmem:[%s5616_s2] ss:$0 sm:$0xff] }
 0x1d0   : > { %v3792_v48 = vpop.f32.mrb[0].mxu1 }
 0x1d1   : > { %v1662_v0 = vpop.f32.mrb[1].mxu1 }
 0x1d2   : > { %v3793_v6 = vpop.f32.mrb[2].mxu1 }
 0x1d3   : > { %v1665_v50 = vpop.f32.mrb[3].mxu1 }
 0x1d8   : > { %v3796_v39 = vpop.f32.mrb[4].mxu1 }
 0x1d9   : > { %v1678_v18 = vpop.f32.mrb[5].mxu1 }
 0x1da   : > { %v3797_v1 = vpop.f32.mrb[6].mxu1 }
 0x1db   : > { %v1681_v57 = vpop.f32.mrb[7].mxu1 }
 0x1e0   : > { %v3800_v9 = vpop.f32.mrb[8].mxu1 }
 0x1e1   : > { %v1694_v63 = vpop.f32.mrb[9].mxu1 }
 0x1e2   : > { %v5433_v44 = vpop.f32.mrb[10].mxu1 }
 0x1e3   : > { %v5435_v19 = vpop.f32.mrb[11].mxu1 }
 0x1e8   : > { %v5437_v23 = vpop.f32.mrb[12].mxu1 }
 0x1e9   : > { %v5439_v49 = vpop.f32.mrb[13].mxu1 }
 0x1ea   : > { %v5441_v12 = vpop.f32.mrb[14].mxu1 }
 0x1eb   : > { %v5443_v31 = vpop.f32.mrb[15].mxu1 }
 0x1f0   : > { %v3962_v5 = vpop.f32.mrb[0].mxu0 }
 0x1f1   : > { %v3994_v60 = vadd.f32 %v3962_v5, %v3792_v48  ;;  %v2748_v35 = vpop.f32.mrb[1].mxu0 }
 0x1f2   : > { %v3995_v29 = vadd.f32 %v2748_v35, %v1662_v0  ;;  %v3963_v3 = vpop.f32.mrb[2].mxu0 }
 0x1f3   : > { %v2916_v55 = vadd.f32 %v3994_v60, %v5449_v32  ;;  %v3996_v28 = vadd.f32 %v3963_v3, %v3793_v6  ;;  %v2751_v33 = vpop.f32.mrb[3].mxu0 }
 0x1f4   : > { %v2914_v14 = vadd.f32 %v3995_v29, %v5449_v32  ;;  %v3997_v13 = vadd.f32 %v2751_v33, %v1665_v50 }
 0x1f5   : > { %v2948_v47 = vmax.f32 %v2916_v55, 0.0  ;;  %v2917_v15 = vadd.f32 %v3996_v28, %v5449_v32 }
 0x1f6   : > { %v2946_v8 = vmax.f32 %v2914_v14, 0.0  ;;  %v2915_v40 = vadd.f32 %v3997_v13, %v5449_v32 }
 0x1f7   : > { %v3502_v38 = vpack.c.bf16 %v2948_v47, %v2948_v47  ;;  %v2949_v11 = vmax.f32 %v2917_v15, 0.0 }
 0x1f8   : > { %v3500_v26 = vpack.c.bf16 %v2946_v8, %v2946_v8  ;;  %v2947_v59 = vmax.f32 %v2915_v40, 0.0  ;;  %v3966_v20 = vpop.f32.mrb[4].mxu0 }
 0x1f9   : > { %3109 = vst.msk [vmem:[%s5457_s9 + $0x8] sm:$0xf] %vm3106_vm9, %v3502_v38  ;;  %v3503_v34 = vpack.c.bf16 %v2949_v11, %v2949_v11  ;;  %v3998_v16 = vadd.f32 %v3966_v20, %v3796_v39  ;;  %v2764_v22 = vpop.f32.mrb[5].mxu0 }
 0x1fa   : > { %3107 = vst.msk [vmem:[%s5457_s9] sm:$0xf] %vm3106_vm9, %v3500_v26  ;;  %v3501_v36 = vpack.c.bf16 %v2947_v59, %v2947_v59  ;;  %v3999_v45 = vadd.f32 %v2764_v22, %v1678_v18  ;;  %v3967_v4 = vpop.f32.mrb[6].mxu0 }
 0x1fb   : > { %3110 = vst.msk [vmem:[%s5457_s9 + $0xc] sm:$0xf] %vm3106_vm9, %v3503_v34  ;;  %v2920_v62 = vadd.f32 %v3998_v16, %v5449_v32  ;;  %v4000_v42 = vadd.f32 %v3967_v4, %v3797_v1  ;;  %v2767_v51 = vpop.f32.mrb[7].mxu0 }
 0x1fc   : > { %3108 = vst.msk [vmem:[%s5457_s9 + $0x4] sm:$0xf] %vm3106_vm9, %v3501_v36  ;;  %v2918_v7 = vadd.f32 %v3999_v45, %v5449_v32  ;;  %v4001_v58 = vadd.f32 %v2767_v51, %v1681_v57 }
 0x1fd   : > { %v2952_v61 = vmax.f32 %v2920_v62, 0.0  ;;  %v2921_v46 = vadd.f32 %v4000_v42, %v5449_v32 }
 0x1fe   : > { %v2950_v2 = vmax.f32 %v2918_v7, 0.0  ;;  %v2919_v30 = vadd.f32 %v4001_v58, %v5449_v32 }
 0x1ff   : > { %v3506_v21 = vpack.c.bf16 %v2952_v61, %v2952_v61  ;;  %v2953_v52 = vmax.f32 %v2921_v46, 0.0 }
 0x200   : > { %v3504_v56 = vpack.c.bf16 %v2950_v2, %v2950_v2  ;;  %v2951_v24 = vmax.f32 %v2919_v30, 0.0  ;;  %v3970_v54 = vpop.f32.mrb[8].mxu0 }
 0x201   : > { %3113 = vst.msk [vmem:[%s5457_s9 + $0x18] sm:$0xf] %vm3106_vm9, %v3506_v21  ;;  %v3507_v53 = vpack.c.bf16 %v2953_v52, %v2953_v52  ;;  %v4002_v41 = vadd.f32 %v3970_v54, %v3800_v9  ;;  %v2780_v37 = vpop.f32.mrb[9].mxu0 }
 0x202   : > { %3111 = vst.msk [vmem:[%s5457_s9 + $0x10] sm:$0xf] %vm3106_vm9, %v3504_v56  ;;  %v3505_v10 = vpack.c.bf16 %v2951_v24, %v2951_v24  ;;  %v4003_v43 = vadd.f32 %v2780_v37, %v1694_v63  ;;  %v3971_v25 = vpop.f32.mrb[10].mxu0 }
 0x203   : > { %3114 = vst.msk [vmem:[%s5457_s9 + $0x1c] sm:$0xf] %vm3106_vm9, %v3507_v53  ;;  %v2924_v27 = vadd.f32 %v4002_v41, %v5449_v32  ;;  %v4004_v17 = vadd.f32 %v3971_v25, %v5433_v44  ;;  %v2783_v48 = vpop.f32.mrb[11].mxu0 }
 0x204   : > { %3112 = vst.msk [vmem:[%s5457_s9 + $0x14] sm:$0xf] %vm3106_vm9, %v3505_v10  ;;  %v2922_v0 = vadd.f32 %v4003_v43, %v5449_v32  ;;  %v4005_v6 = vadd.f32 %v2783_v48, %v5435_v19 }
 0x205   : > { %v2956_v50 = vmax.f32 %v2924_v27, 0.0  ;;  %v2925_v39 = vadd.f32 %v4004_v17, %v5449_v32 }
 0x206   : > { %v2954_v18 = vmax.f32 %v2922_v0, 0.0  ;;  %v2923_v1 = vadd.f32 %v4005_v6, %v5449_v32 }
 0x207   : > { %v3510_v57 = vpack.c.bf16 %v2956_v50, %v2956_v50  ;;  %v2957_v9 = vmax.f32 %v2925_v39, 0.0 }
 0x208   : > { %v3508_v63 = vpack.c.bf16 %v2954_v18, %v2954_v18  ;;  %v2955_v44 = vmax.f32 %v2923_v1, 0.0  ;;  %v3974_v5 = vpop.f32.mrb[12].mxu0 }
 0x209   : > { %3117 = vst.msk [vmem:[%s5457_s9 + $0x28] sm:$0xf] %vm3106_vm9, %v3510_v57  ;;  %v3511_v60 = vpack.c.bf16 %v2957_v9, %v2957_v9  ;;  %v4006_v35 = vadd.f32 %v3974_v5, %v5437_v23  ;;  %v2796_v29 = vpop.f32.mrb[13].mxu0 }
 0x20a   : > { %3115 = vst.msk [vmem:[%s5457_s9 + $0x20] sm:$0xf] %vm3106_vm9, %v3508_v63  ;;  %v3509_v19 = vpack.c.bf16 %v2955_v44, %v2955_v44  ;;  %v4007_v3 = vadd.f32 %v2796_v29, %v5439_v49  ;;  %v3975_v55 = vpop.f32.mrb[14].mxu0 }
 0x20b   : > { %3118 = vst.msk [vmem:[%s5457_s9 + $0x2c] sm:$0xf] %vm3106_vm9, %v3511_v60  ;;  %v2928_v28 = vadd.f32 %v4006_v35, %v5449_v32  ;;  %v4008_v33 = vadd.f32 %v3975_v55, %v5441_v12  ;;  %v2799_v14 = vpop.f32.mrb[15].mxu0 }
 0x20c   : > { %3116 = vst.msk [vmem:[%s5457_s9 + $0x24] sm:$0xf] %vm3106_vm9, %v3509_v19  ;;  %v2926_v13 = vadd.f32 %v4007_v3, %v5449_v32  ;;  %v4009_v23 = vadd.f32 %v2799_v14, %v5443_v31 }
 0x20d   : > { %v2960_v47 = vmax.f32 %v2928_v28, 0.0  ;;  %v2929_v15 = vadd.f32 %v4008_v33, %v5449_v32 }
 0x20e   : > { %v2958_v49 = vmax.f32 %v2926_v13, 0.0  ;;  %v2927_v8 = vadd.f32 %v4009_v23, %v5449_v32 }
 0x20f   : > { %v3514_v40 = vpack.c.bf16 %v2960_v47, %v2960_v47  ;;  %v2961_v38 = vmax.f32 %v2929_v15, 0.0 }
 0x210   : > { %v3512_v11 = vpack.c.bf16 %v2958_v49, %v2958_v49  ;;  %v2959_v26 = vmax.f32 %v2927_v8, 0.0  ;;  %v3842_v12 = vpop.f32.mrb[16].mxu1  ;;  %v3978_v59 = vpop.f32.mrb[16].mxu0 }
 0x211   : > { %3121 = vst.msk [vmem:[%s5457_s9 + $0x38] sm:$0xf] %vm3106_vm9, %v3514_v40  ;;  %v3515_v20 = vpack.c.bf16 %v2961_v38, %v2961_v38  ;;  %v4010_v34 = vadd.f32 %v3978_v59, %v3842_v12  ;;  %v1954_v31 = vpop.f32.mrb[17].mxu1  ;;  %v2812_v16 = vpop.f32.mrb[17].mxu0 }
 0x212   : > { %3119 = vst.msk [vmem:[%s5457_s9 + $0x30] sm:$0xf] %vm3106_vm9, %v3512_v11  ;;  %v3513_v22 = vpack.c.bf16 %v2959_v26, %v2959_v26  ;;  %v4011_v36 = vadd.f32 %v2812_v16, %v1954_v31  ;;  %v3843_v45 = vpop.f32.mrb[18].mxu1  ;;  %v3979_v4 = vpop.f32.mrb[18].mxu0 }
 0x213   : > { %3122 = vst.msk [vmem:[%s5457_s9 + $0x3c] sm:$0xf] %vm3106_vm9, %v3515_v20  ;;  %v2932_v62 = vadd.f32 %v4010_v34, %v5449_v32  ;;  %v4012_v42 = vadd.f32 %v3979_v4, %v3843_v45  ;;  %v1957_v51 = vpop.f32.mrb[19].mxu1  ;;  %v2815_v7 = vpop.f32.mrb[19].mxu0 }
 0x214   : > { %3120 = vst.msk [vmem:[%s5457_s9 + $0x34] sm:$0xf] %vm3106_vm9, %v3513_v22  ;;  %v2930_v58 = vadd.f32 %v4011_v36, %v5449_v32  ;;  %v4013_v61 = vadd.f32 %v2815_v7, %v1957_v51 }
 0x215   : > { %v2964_v46 = vmax.f32 %v2932_v62, 0.0  ;;  %v2933_v2 = vadd.f32 %v4012_v42, %v5449_v32 }
 0x216   : > { %v2962_v30 = vmax.f32 %v2930_v58, 0.0  ;;  %v2931_v21 = vadd.f32 %v4013_v61, %v5449_v32 }
 0x217   : > { %v3518_v52 = vpack.c.bf16 %v2964_v46, %v2964_v46  ;;  %v2965_v56 = vmax.f32 %v2933_v2, 0.0 }
 0x218   : > { %v3516_v24 = vpack.c.bf16 %v2962_v30, %v2962_v30  ;;  %v2963_v54 = vmax.f32 %v2931_v21, 0.0  ;;  %v3846_v53 = vpop.f32.mrb[20].mxu1  ;;  %v3982_v41 = vpop.f32.mrb[20].mxu0 }
 0x219   : > { %3125 = vst.msk [vmem:[%s5457_s9 + $0x48] sm:$0xf] %vm3106_vm9, %v3518_v52  ;;  %v3519_v37 = vpack.c.bf16 %v2965_v56, %v2965_v56  ;;  %v4014_v10 = vadd.f32 %v3982_v41, %v3846_v53  ;;  %v1970_v43 = vpop.f32.mrb[21].mxu1  ;;  %v2828_v25 = vpop.f32.mrb[21].mxu0 }
 0x21a   : > { %3123 = vst.msk [vmem:[%s5457_s9 + $0x40] sm:$0xf] %vm3106_vm9, %v3516_v24  ;;  %v3517_v27 = vpack.c.bf16 %v2963_v54, %v2963_v54  ;;  %v4015_v17 = vadd.f32 %v2828_v25, %v1970_v43  ;;  %v3847_v48 = vpop.f32.mrb[22].mxu1  ;;  %v3983_v0 = vpop.f32.mrb[22].mxu0 }
 0x21b   : > { %3126 = vst.msk [vmem:[%s5457_s9 + $0x4c] sm:$0xf] %vm3106_vm9, %v3519_v37  ;;  %v2936_v6 = vadd.f32 %v4014_v10, %v5449_v32  ;;  %v4016_v50 = vadd.f32 %v3983_v0, %v3847_v48  ;;  %v1973_v39 = vpop.f32.mrb[23].mxu1  ;;  %v2831_v18 = vpop.f32.mrb[23].mxu0 }
 0x21c   : > { %3124 = vst.msk [vmem:[%s5457_s9 + $0x44] sm:$0xf] %vm3106_vm9, %v3517_v27  ;;  %v2934_v1 = vadd.f32 %v4015_v17, %v5449_v32  ;;  %v4017_v57 = vadd.f32 %v2831_v18, %v1973_v39 }
 0x21d   : > { %v2968_v9 = vmax.f32 %v2936_v6, 0.0  ;;  %v2937_v63 = vadd.f32 %v4016_v50, %v5449_v32 }
 0x21e   : > { %v2966_v44 = vmax.f32 %v2934_v1, 0.0  ;;  %v2935_v5 = vadd.f32 %v4017_v57, %v5449_v32 }
 0x21f   : > { %v3522_v60 = vpack.c.bf16 %v2968_v9, %v2968_v9  ;;  %v2969_v35 = vmax.f32 %v2937_v63, 0.0 }
 0x220   : > { %v3520_v29 = vpack.c.bf16 %v2966_v44, %v2966_v44  ;;  %v2967_v19 = vmax.f32 %v2935_v5, 0.0  ;;  %v3850_v3 = vpop.f32.mrb[24].mxu1  ;;  %v3986_v55 = vpop.f32.mrb[24].mxu0 }
 0x221   : > { %3129 = vst.msk [vmem:[%s5457_s9 + $0x58] sm:$0xf] %vm3106_vm9, %v3522_v60  ;;  %v3523_v28 = vpack.c.bf16 %v2969_v35, %v2969_v35  ;;  %v4018_v33 = vadd.f32 %v3986_v55, %v3850_v3  ;;  %v1986_v14 = vpop.f32.mrb[25].mxu1  ;;  %v2844_v13 = vpop.f32.mrb[25].mxu0 }
 0x222   : > { %3127 = vst.msk [vmem:[%s5457_s9 + $0x50] sm:$0xf] %vm3106_vm9, %v3520_v29  ;;  %v3521_v23 = vpack.c.bf16 %v2967_v19, %v2967_v19  ;;  %v4019_v47 = vadd.f32 %v2844_v13, %v1986_v14  ;;  %v3851_v15 = vpop.f32.mrb[26].mxu1  ;;  %v3987_v49 = vpop.f32.mrb[26].mxu0 }
 0x223   : > { %3130 = vst.msk [vmem:[%s5457_s9 + $0x5c] sm:$0xf] %vm3106_vm9, %v3523_v28  ;;  %v2940_v8 = vadd.f32 %v4018_v33, %v5449_v32  ;;  %v4020_v40 = vadd.f32 %v3987_v49, %v3851_v15  ;;  %v1989_v38 = vpop.f32.mrb[27].mxu1  ;;  %v2847_v11 = vpop.f32.mrb[27].mxu0 }
 0x224   : > { %3128 = vst.msk [vmem:[%s5457_s9 + $0x54] sm:$0xf] %vm3106_vm9, %v3521_v23  ;;  %v2938_v26 = vadd.f32 %v4019_v47, %v5449_v32  ;;  %v4021_v12 = vadd.f32 %v2847_v11, %v1989_v38 }
 0x225   : > { %v2972_v59 = vmax.f32 %v2940_v8, 0.0  ;;  %v2941_v20 = vadd.f32 %v4020_v40, %v5449_v32 }
 0x226   : > { %v2970_v34 = vmax.f32 %v2938_v26, 0.0  ;;  %v2939_v31 = vadd.f32 %v4021_v12, %v5449_v32 }
 0x227   : > { %v3526_v16 = vpack.c.bf16 %v2972_v59, %v2972_v59  ;;  %v2973_v22 = vmax.f32 %v2941_v20, 0.0 }
 0x228   : > { %v3524_v36 = vpack.c.bf16 %v2970_v34, %v2970_v34  ;;  %v2971_v45 = vmax.f32 %v2939_v31, 0.0  ;;  %v3854_v4 = vpop.f32.mrb[28].mxu1  ;;  %v3990_v62 = vpop.f32.mrb[28].mxu0 }
 0x229   : > { %3133 = vst.msk [vmem:[%s5457_s9 + $0x68] sm:$0xf] %vm3106_vm9, %v3526_v16  ;;  %v3527_v42 = vpack.c.bf16 %v2973_v22, %v2973_v22  ;;  %v4022_v51 = vadd.f32 %v3990_v62, %v3854_v4  ;;  %v2002_v7 = vpop.f32.mrb[29].mxu1  ;;  %v2860_v58 = vpop.f32.mrb[29].mxu0 }
 0x22a   : > { %3131 = vst.msk [vmem:[%s5457_s9 + $0x60] sm:$0xf] %vm3106_vm9, %v3524_v36  ;;  %v3525_v61 = vpack.c.bf16 %v2971_v45, %v2971_v45  ;;  %v4023_v46 = vadd.f32 %v2860_v58, %v2002_v7  ;;  %v3855_v2 = vpop.f32.mrb[30].mxu1  ;;  %v3991_v30 = vpop.f32.mrb[30].mxu0 }
 0x22b   : > { %3134 = vst.msk [vmem:[%s5457_s9 + $0x6c] sm:$0xf] %vm3106_vm9, %v3527_v42  ;;  %v2944_v21 = vadd.f32 %v4022_v51, %v5449_v32  ;;  %v4024_v52 = vadd.f32 %v3991_v30, %v3855_v2  ;;  %v2005_v56 = vpop.f32.mrb[31].mxu1  ;;  %v2863_v24 = vpop.f32.mrb[31].mxu0 }
 0x22c   : > { %3132 = vst.msk [vmem:[%s5457_s9 + $0x64] sm:$0xf] %vm3106_vm9, %v3525_v61  ;;  %v2942_v54 = vadd.f32 %v4023_v46, %v5449_v32  ;;  %v4025_v53 = vadd.f32 %v2863_v24, %v2005_v56 }
 0x22d   : > { %v2976_v41 = vmax.f32 %v2944_v21, 0.0  ;;  %v2945_v37 = vadd.f32 %v4024_v52, %v5449_v32 }
 0x22e   : > { %v2974_v10 = vmax.f32 %v2942_v54, 0.0  ;;  %v2943_v43 = vadd.f32 %v4025_v53, %v5449_v32 }
 0x22f   : > { %v3530_v25 = vpack.c.bf16 %v2976_v41, %v2976_v41  ;;  %v2977_v27 = vmax.f32 %v2945_v37, 0.0 }
 0x230   : > { %v3528_v17 = vpack.c.bf16 %v2974_v10, %v2974_v10  ;;  %v2975_v48 = vmax.f32 %v2943_v43, 0.0 }
 0x231   : > { %3137 = vst.msk [vmem:[%s5457_s9 + $0x78] sm:$0xf] %vm3106_vm9, %v3530_v25  ;;  %v3531_v0 = vpack.c.bf16 %v2977_v27, %v2977_v27 }
 0x232   : > { %3135 = vst.msk [vmem:[%s5457_s9 + $0x70] sm:$0xf] %vm3106_vm9, %v3528_v17  ;;  %v3529_v32 = vpack.c.bf16 %v2975_v48, %v2975_v48 }
 0x233   : > { %3138 = vst.msk [vmem:[%s5457_s9 + $0x7c] sm:$0xf] %vm3106_vm9, %v3531_v0 }
 0x234   : > { %3136 = vst.msk [vmem:[%s5457_s9 + $0x74] sm:$0xf] %vm3106_vm9, %v3529_v32 }
 0x235   : > { %4343 = shalt.err (!%p4340_p5)
}
 0x236   : > { %s4344_s29 = scalar_lea.hbm %s5556_s21, 2048  ;;  %s4348_s5 = scalar_lea.hbm %s5617_s3, 4096 }
 0x237   : > { %p4345_p6 = scmp.ne.s32.totalorder %s5556_s21, %s4344_s29  ;;  %p4349_p10 = scmp.lt.u32.totalorder %s5556_s21, %s5617_s3 }
 0x238   : > { %p4350_p11 = scmp.lt.u32.totalorder %s4348_s5, %s4344_s29  ;;  %p4352_p13 = scmp.lt.u32.totalorder %s4344_s29, %s5556_s21 }
 0x239   : > { %p4346_p7 = pnand %p4345_p6, %p4474_p4 }
 0x23a   : > { %p4351_p12 = por %p4350_p11, %p4349_p10 }
 0x23b   : > { %p4347_p9 = pneg %p4346_p7 }
 0x23c   : > { %p4353_p0 = por %p4352_p13, %p4351_p12 }
 0x23e   : > { %p4354_p1 = pnand %p4353_p0, %p4347_p9 }
 0x240   : > { %4357 = shalt.err (!%p4354_p1)
}
 0x241   : > { %s4412_s8 = smov 64   ;;  %s4413_s9 = smov 4  }
 0x242   : > { %4251 = dma.vmem_to_hbm [thread:$0]  (%p4474_p4), %s5558_s11, 2048, %s5556_s21, %s5568_s15, %s4412_s8, %s4412_s8, %s4413_s9  }
 0x243 PF: > { %p4257_p2 = scmp.ge.s32.totalorder %s4408_s17, 2  ;;  %s3171_s10 = sand.u32 1, %s4388_s12  }
 0x244   : > { %s3172_s18 = scalar_lea.sflag [#allocation3], %s3171_s10 }
 0x245   : > { %p4254_p3 = pnand %p4257_p2, %p4481_p8 }
 0x247   : > { %4383 = dma.done.wait (!%p4254_p3), %s3172_s18, 2048  }
 0x248   : > { %4385 = vsyncadd (!%p4254_p3), %s3172_s18, 4294965248  ;;  %s16_s17 = sadd.s32 1, %s4408_s17   ;;  %s5701_s12 = smov %s4392_s13 }
 0x249   : > { %p13_p5 = scmp.ge.s32.totalorder %s16_s17, 4   ;;  %s5702_s13 = smov %s4396_s14 }
 0x24a   : > { %s5703_s14 = smov %s4487_s25  ;;  %s5704_s15 = smov %s4404_s16 }
 0x24b   : > { %s5705_s16 = smov %s5707_s20  ;;  %15 = sbr.rel (!%p13_p5) target bundleno = 4 (0x4), region = 76 }
 0x252   :  { %3177 = vsyncpa [#allocation3], 1 }
 0x253   :  { %3179 = vsyncpa [#allocation3 + $0x1], 1 }

</bundles_post_ra>
